<compile_context>
chip_gen: v5e
topology: v5e:2x2
jax: 0.10.0
libtpu: 0.0.40
codegen_flags: <defaults>
</compile_context>

<pallas_src>
import functools

import jax
import jax.numpy as jnp
import numpy as np
from jax import lax
from jax.experimental import pallas as pl
from jax.experimental.pallas import tpu as pltpu


def _encoder_kernel(x_ref, w_ref, b_ref, out_ref, s0, s1, *,
                    seq_len, batch_tile, hidden):
    T, Bt, H = seq_len, batch_tile, hidden
    H2 = 2 * H
    f32, bf16 = jnp.float32, jnp.bfloat16

    x = x_ref[0]                                        # (T*Bt, H) bf16, row = t*Bt + b

    # Packed parameter slabs (static sub-slices are free views).
    w_ih0 = w_ref[pl.ds(0, H), :]                       # (H, 2H)   [W_ih0_f | W_ih0_b]
    w_hh0 = w_ref[pl.ds(H, H2), :]                      # (2H, 2H)  blockdiag(W_hh0_f, W_hh0_b)
    w_ih1 = w_ref[pl.ds(3 * H, H2), :]                  # (2H, 2H)  [W_ih1_f | W_ih1_b]
    w_hh1 = w_ref[pl.ds(5 * H, H2), :]                  # (2H, 2H)  blockdiag(W_hh1_f, W_hh1_b)
    w_lin = w_ref[pl.ds(7 * H, H2), pl.ds(0, H)]        # (2H, H)
    b0 = b_ref[pl.ds(0, 1), :]                          # (1, 2H)   b_ih + b_hh, both dirs
    b1 = b_ref[pl.ds(1, 1), :]                          # (1, 2H)
    b_lin = b_ref[pl.ds(2, 1), pl.ds(0, H)]             # (1, H)

    # lanes [:H] carry the forward chain, lanes [H:] the backward chain.
    fwd_lanes = lax.broadcasted_iota(jnp.int32, (Bt, H2), 1) < H

    def recurrence(slab, w_hh):
        # `slab` holds the pre-activations (x_t @ W_ih + b) for every t, forward time
        # order in BOTH lane halves; it is overwritten in place with the hidden states
        # h_t (also forward time order).  Both directions are packed along lanes with a
        # block-diagonal W_hh, so the serial critical path is ONE matmul + ONE tanh per
        # step; the lane selects / read-modify-write stores are VPU work off that path.
        # TODO(synk): for large T switch to lax.fori_loop(..., unroll=4..8) with
        # pl.multiple_of'd pl.ds offsets; optionally drive the MXU via matmul_push_rhs so
        # the constant W_hh is pushed into weight registers once per layer (v5e/v6e MRF).
        h = jnp.zeros((Bt, H2), f32)
        for i in range(T):                              # fully unrolled: T small & static
            rf = i * Bt                                 # forward chain -> timestep i
            rb = (T - 1 - i) * Bt                       # backward chain -> timestep T-1-i
            row_f = slab[pl.ds(rf, Bt), :]
            row_b = slab[pl.ds(rb, Bt), :]
            pre = jnp.where(fwd_lanes, row_f, row_b)    # [pre_f(i) | pre_b(T-1-i)]
            h = jnp.tanh(pre + jnp.dot(h.astype(bf16), w_hh,
                                       preferred_element_type=f32))
            # Scatter the two halves back in forward time order; the untouched lane half
            # of each row keeps its not-yet-consumed pre-activation (or final state).
            slab[pl.ds(rf, Bt), :] = jnp.where(fwd_lanes, h, row_f)
            slab[pl.ds(rb, Bt), :] = jnp.where(fwd_lanes, slab[pl.ds(rb, Bt), :], h)

    # ---- Layer 0: hoisted input projection, both directions in one matmul ----
    s0[...] = jnp.dot(x, w_ih0, preferred_element_type=f32) + b0
    recurrence(s0, w_hh0)

    # ---- Layer 1: input is concat(h0_fwd, h0_bwd) == the packed slab itself ----
    # TODO(synk): nn.RNN inter-layer dropout (p=0.1) only applies in training mode;
    # eval-mode semantics (no dropout) are implemented here.
    s1[...] = jnp.dot(s0[...].astype(bf16), w_ih1, preferred_element_type=f32) + b1
    recurrence(s1, w_hh1)

    # ---- Linear(2H -> H) over all timesteps + vectorized max over time (no y slab) ----
    y = jnp.dot(s1[...].astype(bf16), w_lin, preferred_element_type=f32) + b_lin
    out_ref[...] = jnp.max(y.reshape(T, Bt, H), axis=0)


def _round_up(n, m):
    return -(-n // m) * m


def _block_diag(a, b):
    H = a.shape[0]
    out = jnp.zeros((2 * H, 2 * H), a.dtype)
    return out.at[:H, :H].set(a).at[H:, H:].set(b)


def _vmem_ceiling_bytes():
    # Generation-aware ceiling with ~16 MiB headroom for Mosaic internal scratch
    # (v7x: 64 MiB physical -> ~48 MiB usable; v5e/v6e: 128 MiB -> ~112 MiB).
    try:
        cap = int(pltpu.get_tpu_info().vmem_capacity_bytes)
    except Exception:
        cap = 64 << 20
    return max(32 << 20, cap - (16 << 20))


def init_params(key, vocab_size, hidden_size):
    H = hidden_size
    V = vocab_size + 1
    bound = 1.0 / np.sqrt(H)
    keys = jax.random.split(key, 32)
    it = iter(keys)

    def u(shape):
        return jax.random.uniform(next(it), shape, jnp.float32, -bound, bound)

    emb = jax.random.normal(next(it), (V, H), jnp.float32)
    emb = emb.at[0].set(0.0)                            # padding_idx=0

    rnn = {}
    for layer, din in ((0, H), (1, 2 * H)):
        for d in ("f", "b"):
            rnn[f"wih{layer}{d}"] = u((din, H))         # W_ih^T
            rnn[f"whh{layer}{d}"] = u((H, H))           # W_hh^T
            rnn[f"bih{layer}{d}"] = u((1, H))
            rnn[f"bhh{layer}{d}"] = u((1, H))

    return {
        "embedding": emb,
        "rnn": rnn,
        "wlin": u((2 * H, H)),                          # Linear weight^T
        "blin": u((1, H)),
    }


@jax.jit
def sentence_encoder(x_ids, params):
    emb = params["embedding"]
    B, T = x_ids.shape
    H = emb.shape[1]
    H2 = 2 * H
    assert H % 16 == 0, "hidden_size must be a multiple of 16 (bf16 sublane tiling)"

    # Batch tiling: pad to a multiple of the tile (>=16 keeps bf16/f32 sublane tiles
    # aligned); each tile is an independent grid step ("parallel" -> v7x megacore).
    TB = min(_round_up(B, 16), 64)
    Bp = _round_up(B, TB)
    nb = Bp // TB
    if Bp != B:
        x_ids = jnp.concatenate([x_ids, jnp.zeros((Bp - B, T), x_ids.dtype)], axis=0)

    # Embed, then lay out time-major per batch tile: (nb, T*TB, H), bf16 MXU operands.
    # TODO(synk): move this gather into the kernel (scalar-prefetch ids + pl.ANY table)
    # to avoid the HBM round-trip of the activation slab at large sizes.
    xt = jnp.take(emb, x_ids.T, axis=0)                           # (T, Bp, H) f32
    x = (xt.reshape(T, nb, TB, H).transpose(1, 0, 2, 3)
           .reshape(nb, T * TB, H).astype(jnp.bfloat16))

    # Pack all weights into one bf16 slab and all biases into one f32 slab (3 input DMAs
    # instead of ~18).  W_hh is block-diagonal so fwd/bwd share one matmul per step.
    r = params["rnn"]
    w_ih0 = jnp.concatenate([r["wih0f"], r["wih0b"]], axis=1)             # (H, 2H)
    w_hh0 = _block_diag(r["whh0f"], r["whh0b"])                           # (2H, 2H)
    w_ih1 = jnp.concatenate([r["wih1f"], r["wih1b"]], axis=1)             # (2H, 2H)
    w_hh1 = _block_diag(r["whh1f"], r["whh1b"])                           # (2H, 2H)
    w_lin = jnp.concatenate([params["wlin"],
                             jnp.zeros((H2, H), jnp.float32)], axis=1)    # (2H, 2H) padded
    w_pack = jnp.concatenate([w_ih0, w_hh0, w_ih1, w_hh1, w_lin],
                             axis=0).astype(jnp.bfloat16)                 # (9H, 2H)

    b0 = jnp.concatenate([r["bih0f"] + r["bhh0f"], r["bih0b"] + r["bhh0b"]], axis=1)
    b1 = jnp.concatenate([r["bih1f"] + r["bhh1f"], r["bih1b"] + r["bhh1b"]], axis=1)
    bl = jnp.concatenate([params["blin"], jnp.zeros((1, H), jnp.float32)], axis=1)
    b_pack = jnp.concatenate([b0, b1, bl,
                              jnp.zeros((5, H2), jnp.float32)], axis=0)   # (8, 2H)

    # Real VMEM footprint (padded to (sublane, lane) tiles) + pipeline double-buffering.
    def pad_tile(rows, cols, itemsize):
        return (_round_up(rows, 32 // itemsize) * _round_up(cols, 128) * itemsize)

    slab = pad_tile(T * TB, H2, 4)
    need = (2 * (pad_tile(T * TB, H, 2)        # x tile (double-buffered)
                 + pad_tile(9 * H, H2, 2)      # weight slab
                 + pad_tile(8, H2, 4)          # bias slab
                 + pad_tile(TB, H, 4))         # output tile
            + 2 * slab                         # persistent scratch (s0, s1)
            + 2 * slab                         # in-flight value temps (bf16 casts, y)
            + (2 << 20))                       # margin
    vmem_bytes = int(min(_vmem_ceiling_bytes(), max(need, 8 << 20)))

    kernel = functools.partial(_encoder_kernel, seq_len=T, batch_tile=TB, hidden=H)
    out = pl.pallas_call(
        kernel,
        out_shape=jax.ShapeDtypeStruct((Bp, H), jnp.float32),
        grid=(nb,),
        in_specs=[
            pl.BlockSpec((1, T * TB, H), lambda j: (j, 0, 0)),   # per-tile activations
            pl.BlockSpec((9 * H, H2), lambda j: (0, 0)),         # weights: resident
            pl.BlockSpec((8, H2), lambda j: (0, 0)),             # biases:  resident
        ],
        out_specs=pl.BlockSpec((TB, H), lambda j: (j, 0)),
        scratch_shapes=[pltpu.VMEM((T * TB, H2), jnp.float32)] * 2,
        compiler_params=pltpu.CompilerParams(
            dimension_semantics=("parallel",),
            vmem_limit_bytes=vmem_bytes),
    )(x, w_pack, b_pack)
    return out[:B]


def reference(x_ids, params, matmul_dtype=jnp.float32):
    # Pure-JAX reference mirroring PyTorch eval-mode semantics.  matmul_dtype controls the
    # matmul operand precision (f32 = exact torch semantics; bf16 = kernel numerics).
    emb = params["embedding"]
    x = jnp.take(emb, x_ids, axis=0)                              # (B, T, H)
    r = params["rnn"]

    def mm(a, b):
        return jnp.dot(a.astype(matmul_dtype), b.astype(matmul_dtype),
                       preferred_element_type=jnp.float32)

    def run_dir(xs, wih, whh, b, reverse):
        T = xs.shape[1]
        order = range(T - 1, -1, -1) if reverse else range(T)
        h = jnp.zeros((xs.shape[0], whh.shape[0]), jnp.float32)
        outs = [None] * T
        for t in order:
            h = jnp.tanh(mm(xs[:, t], wih) + mm(h, whh) + b)
            outs[t] = h
        return jnp.stack(outs, axis=1)                            # (B, T, H)

    def layer(xs, lid):
        f = run_dir(xs, r[f"wih{lid}f"], r[f"whh{lid}f"],
                    r[f"bih{lid}f"] + r[f"bhh{lid}f"], False)
        bw = run_dir(xs, r[f"wih{lid}b"], r[f"whh{lid}b"],
                     r[f"bih{lid}b"] + r[f"bhh{lid}b"], True)
        return jnp.concatenate([f, bw], axis=-1)

    h = layer(layer(x, 0), 1)                                     # (B, T, 2H)
    y = mm(h, params["wlin"]) + params["blin"]                    # (B, T, H)
    return jnp.max(y, axis=1)                                     # (B, H)


if __name__ == "__main__":
    config = {"hidden_size": 32, "vocab_size": 30}
    B, T = 2, 8

    key = jax.random.PRNGKey(0)
    kp, kx = jax.random.split(key)
    params = init_params(kp, config["vocab_size"], config["hidden_size"])
    x_ids = jax.random.randint(kx, (B, T), 0, config["vocab_size"] + 1, jnp.int32)

    out = sentence_encoder(x_ids, params)
    out = jax.block_until_ready(out)
    out_np = np.asarray(out)

    # Tight check vs. a reference that mirrors the kernel's numerics (bf16 MXU operands,
    # f32 accumulate / add / tanh) -- verifies the computation structure exactly.
    ref_bf16 = np.asarray(reference(x_ids, params, jnp.bfloat16))
    np.testing.assert_allclose(out_np, ref_bf16, rtol=5e-3, atol=5e-3)

    # Loose check vs. the pure-f32 PyTorch-equivalent reference (difference is bf16
    # operand rounding only).
    ref_f32 = np.asarray(reference(x_ids, params, jnp.float32))
    np.testing.assert_allclose(out_np, ref_f32, rtol=5e-2, atol=5e-2)

    print("KERNEL_OK")
</pallas_src>

<mosaic_0001>
module attributes {stable_mosaic.version = 11 : i64} {
  func.func @_encoder_kernel(%arg0: i32, %arg1: memref<1x128x32xbf16, #tpu.memory_space<vmem>>, %arg2: memref<288x64xbf16, #tpu.memory_space<vmem>>, %arg3: memref<8x64xf32, #tpu.memory_space<vmem>>, %arg4: memref<16x32xf32, #tpu.memory_space<vmem>>, %arg5: memref<128x64xf32, #tpu.memory_space<vmem>>, %arg6: memref<128x64xf32, #tpu.memory_space<vmem>>) attributes {dimension_semantics = [#tpu.dimension_semantics<parallel>], iteration_bounds = array<i64: 1>, scalar_prefetch = 0 : i64, scratch_operands = 2 : i64, tpu.core_type = #tpu.core_type<tc>, window_params = [{transform_indices = @transform_0, window_bounds = array<i64: 1, 128, 32>}, {pipeline_mode = #tpu.pipeline_mode<synchronous>, transform_indices = @transform_1, window_bounds = array<i64: 288, 64>}, {pipeline_mode = #tpu.pipeline_mode<synchronous>, transform_indices = @transform_2, window_bounds = array<i64: 8, 64>}, {transform_indices = @transform_3, window_bounds = array<i64: 16, 32>}]} {
    %c0 = arith.constant 0 : index
    %c0_0 = arith.constant 0 : index
    %c0_1 = arith.constant 0 : index
    %0 = vector.load %arg1[%c0, %c0_0, %c0_1] : memref<1x128x32xbf16, #tpu.memory_space<vmem>>, vector<1x128x32xbf16>
    %1 = vector.shape_cast %0 : vector<1x128x32xbf16> to vector<128x32xbf16>
    %c0_2 = arith.constant 0 : index
    %c0_3 = arith.constant 0 : index
    %2 = vector.load %arg2[%c0_2, %c0_3] : memref<288x64xbf16, #tpu.memory_space<vmem>>, vector<32x64xbf16>
    %c32 = arith.constant 32 : index
    %c0_4 = arith.constant 0 : index
    %3 = vector.load %arg2[%c32, %c0_4] : memref<288x64xbf16, #tpu.memory_space<vmem>>, vector<64x64xbf16>
    %c96 = arith.constant 96 : index
    %c0_5 = arith.constant 0 : index
    %4 = vector.load %arg2[%c96, %c0_5] : memref<288x64xbf16, #tpu.memory_space<vmem>>, vector<64x64xbf16>
    %c160 = arith.constant 160 : index
    %c0_6 = arith.constant 0 : index
    %5 = vector.load %arg2[%c160, %c0_6] : memref<288x64xbf16, #tpu.memory_space<vmem>>, vector<64x64xbf16>
    %c224 = arith.constant 224 : index
    %c0_7 = arith.constant 0 : index
    %6 = vector.load %arg2[%c224, %c0_7] : memref<288x64xbf16, #tpu.memory_space<vmem>>, vector<64x32xbf16>
    %c0_8 = arith.constant 0 : index
    %c0_9 = arith.constant 0 : index
    %7 = vector.load %arg3[%c0_8, %c0_9] : memref<8x64xf32, #tpu.memory_space<vmem>>, vector<1x64xf32>
    %c1 = arith.constant 1 : index
    %c0_10 = arith.constant 0 : index
    %8 = vector.load %arg3[%c1, %c0_10] : memref<8x64xf32, #tpu.memory_space<vmem>>, vector<1x64xf32>
    %c2 = arith.constant 2 : index
    %c0_11 = arith.constant 0 : index
    %9 = vector.load %arg3[%c2, %c0_11] : memref<8x64xf32, #tpu.memory_space<vmem>>, vector<1x32xf32>
    %10 = tpu.iota {dimensions = array<i32: 1>} : vector<16x64xi32>
    %c32_i32 = arith.constant 32 : i32
    %11 = vector.broadcast %c32_i32 : i32 to vector<16x64xi32>
    %12 = arith.cmpi slt, %10, %11 : vector<16x64xi32>
    %cst = arith.constant dense<0.000000e+00> : vector<128x64xf32>
    %13 = tpu.matmul %1, %2, %cst {dimension_numbers = #tpu.dot_dimension_numbers<[1], [0], [0], [1], [0, 0, 1, 1], [], []>} : vector<128x32xbf16>, vector<32x64xbf16>, vector<128x64xf32> -> vector<128x64xf32>
    %14 = vector.broadcast %7 : vector<1x64xf32> to vector<128x64xf32>
    %15 = arith.addf %13, %14 : vector<128x64xf32>
    %c0_12 = arith.constant 0 : index
    %c0_13 = arith.constant 0 : index
    %16 = vector.load %arg5[%c0_12, %c0_13] : memref<128x64xf32, #tpu.memory_space<vmem>>, vector<128x64xf32>
    tpu.vector_store %arg5[%c0_12, %c0_13], %15 {strides = array<i32>} : memref<128x64xf32, #tpu.memory_space<vmem>>, vector<128x64xf32>,
    %cst_14 = arith.constant 0.000000e+00 : f32
    %17 = vector.broadcast %cst_14 : f32 to vector<16x64xf32>
    %c0_15 = arith.constant 0 : index
    %c0_16 = arith.constant 0 : index
    %18 = vector.load %arg5[%c0_15, %c0_16] : memref<128x64xf32, #tpu.memory_space<vmem>>, vector<16x64xf32>
    %c112 = arith.constant 112 : index
    %c0_17 = arith.constant 0 : index
    %19 = vector.load %arg5[%c112, %c0_17] : memref<128x64xf32, #tpu.memory_space<vmem>>, vector<16x64xf32>
    %20 = arith.select %12, %18, %19 : vector<16x64xi1>, vector<16x64xf32>
    %21 = arith.truncf %17 : vector<16x64xf32> to vector<16x64xbf16>
    %cst_18 = arith.constant dense<0.000000e+00> : vector<16x64xf32>
    %22 = tpu.matmul %21, %3, %cst_18 {dimension_numbers = #tpu.dot_dimension_numbers<[1], [0], [0], [1], [0, 0, 1, 1], [], []>} : vector<16x64xbf16>, vector<64x64xbf16>, vector<16x64xf32> -> vector<16x64xf32>
    %23 = arith.addf %20, %22 : vector<16x64xf32>
    %24 = math.tanh %23 : vector<16x64xf32>
    %25 = arith.select %12, %24, %18 : vector<16x64xi1>, vector<16x64xf32>
    %c0_19 = arith.constant 0 : index
    %c0_20 = arith.constant 0 : index
    %26 = vector.load %arg5[%c0_19, %c0_20] : memref<128x64xf32, #tpu.memory_space<vmem>>, vector<16x64xf32>
    tpu.vector_store %arg5[%c0_19, %c0_20], %25 {strides = array<i32>} : memref<128x64xf32, #tpu.memory_space<vmem>>, vector<16x64xf32>,
    %c112_21 = arith.constant 112 : index
    %c0_22 = arith.constant 0 : index
    %27 = vector.load %arg5[%c112_21, %c0_22] : memref<128x64xf32, #tpu.memory_space<vmem>>, vector<16x64xf32>
    %28 = arith.select %12, %27, %24 : vector<16x64xi1>, vector<16x64xf32>
    %c112_23 = arith.constant 112 : index
    %c0_24 = arith.constant 0 : index
    %29 = vector.load %arg5[%c112_23, %c0_24] : memref<128x64xf32, #tpu.memory_space<vmem>>, vector<16x64xf32>
    tpu.vector_store %arg5[%c112_23, %c0_24], %28 {strides = array<i32>} : memref<128x64xf32, #tpu.memory_space<vmem>>, vector<16x64xf32>,
    %c16 = arith.constant 16 : index
    %c0_25 = arith.constant 0 : index
    %30 = vector.load %arg5[%c16, %c0_25] : memref<128x64xf32, #tpu.memory_space<vmem>>, vector<16x64xf32>
    %c96_26 = arith.constant 96 : index
    %c0_27 = arith.constant 0 : index
    %31 = vector.load %arg5[%c96_26, %c0_27] : memref<128x64xf32, #tpu.memory_space<vmem>>, vector<16x64xf32>
    %32 = arith.select %12, %30, %31 : vector<16x64xi1>, vector<16x64xf32>
    %33 = arith.truncf %24 : vector<16x64xf32> to vector<16x64xbf16>
    %cst_28 = arith.constant dense<0.000000e+00> : vector<16x64xf32>
    %34 = tpu.matmul %33, %3, %cst_28 {dimension_numbers = #tpu.dot_dimension_numbers<[1], [0], [0], [1], [0, 0, 1, 1], [], []>} : vector<16x64xbf16>, vector<64x64xbf16>, vector<16x64xf32> -> vector<16x64xf32>
    %35 = arith.addf %32, %34 : vector<16x64xf32>
    %36 = math.tanh %35 : vector<16x64xf32>
    %37 = arith.select %12, %36, %30 : vector<16x64xi1>, vector<16x64xf32>
    %c16_29 = arith.constant 16 : index
    %c0_30 = arith.constant 0 : index
    %38 = vector.load %arg5[%c16_29, %c0_30] : memref<128x64xf32, #tpu.memory_space<vmem>>, vector<16x64xf32>
    tpu.vector_store %arg5[%c16_29, %c0_30], %37 {strides = array<i32>} : memref<128x64xf32, #tpu.memory_space<vmem>>, vector<16x64xf32>,
    %c96_31 = arith.constant 96 : index
    %c0_32 = arith.constant 0 : index
    %39 = vector.load %arg5[%c96_31, %c0_32] : memref<128x64xf32, #tpu.memory_space<vmem>>, vector<16x64xf32>
    %40 = arith.select %12, %39, %36 : vector<16x64xi1>, vector<16x64xf32>
    %c96_33 = arith.constant 96 : index
    %c0_34 = arith.constant 0 : index
    %41 = vector.load %arg5[%c96_33, %c0_34] : memref<128x64xf32, #tpu.memory_space<vmem>>, vector<16x64xf32>
    tpu.vector_store %arg5[%c96_33, %c0_34], %40 {strides = array<i32>} : memref<128x64xf32, #tpu.memory_space<vmem>>, vector<16x64xf32>,
    %c32_35 = arith.constant 32 : index
    %c0_36 = arith.constant 0 : index
    %42 = vector.load %arg5[%c32_35, %c0_36] : memref<128x64xf32, #tpu.memory_space<vmem>>, vector<16x64xf32>
    %c80 = arith.constant 80 : index
    %c0_37 = arith.constant 0 : index
    %43 = vector.load %arg5[%c80, %c0_37] : memref<128x64xf32, #tpu.memory_space<vmem>>, vector<16x64xf32>
    %44 = arith.select %12, %42, %43 : vector<16x64xi1>, vector<16x64xf32>
    %45 = arith.truncf %36 : vector<16x64xf32> to vector<16x64xbf16>
    %cst_38 = arith.constant dense<0.000000e+00> : vector<16x64xf32>
    %46 = tpu.matmul %45, %3, %cst_38 {dimension_numbers = #tpu.dot_dimension_numbers<[1], [0], [0], [1], [0, 0, 1, 1], [], []>} : vector<16x64xbf16>, vector<64x64xbf16>, vector<16x64xf32> -> vector<16x64xf32>
    %47 = arith.addf %44, %46 : vector<16x64xf32>
    %48 = math.tanh %47 : vector<16x64xf32>
    %49 = arith.select %12, %48, %42 : vector<16x64xi1>, vector<16x64xf32>
    %c32_39 = arith.constant 32 : index
    %c0_40 = arith.constant 0 : index
    %50 = vector.load %arg5[%c32_39, %c0_40] : memref<128x64xf32, #tpu.memory_space<vmem>>, vector<16x64xf32>
    tpu.vector_store %arg5[%c32_39, %c0_40], %49 {strides = array<i32>} : memref<128x64xf32, #tpu.memory_space<vmem>>, vector<16x64xf32>,
    %c80_41 = arith.constant 80 : index
    %c0_42 = arith.constant 0 : index
    %51 = vector.load %arg5[%c80_41, %c0_42] : memref<128x64xf32, #tpu.memory_space<vmem>>, vector<16x64xf32>
    %52 = arith.select %12, %51, %48 : vector<16x64xi1>, vector<16x64xf32>
    %c80_43 = arith.constant 80 : index
    %c0_44 = arith.constant 0 : index
    %53 = vector.load %arg5[%c80_43, %c0_44] : memref<128x64xf32, #tpu.memory_space<vmem>>, vector<16x64xf32>
    tpu.vector_store %arg5[%c80_43, %c0_44], %52 {strides = array<i32>} : memref<128x64xf32, #tpu.memory_space<vmem>>, vector<16x64xf32>,
    %c48 = arith.constant 48 : index
    %c0_45 = arith.constant 0 : index
    %54 = vector.load %arg5[%c48, %c0_45] : memref<128x64xf32, #tpu.memory_space<vmem>>, vector<16x64xf32>
    %c64 = arith.constant 64 : index
    %c0_46 = arith.constant 0 : index
    %55 = vector.load %arg5[%c64, %c0_46] : memref<128x64xf32, #tpu.memory_space<vmem>>, vector<16x64xf32>
    %56 = arith.select %12, %54, %55 : vector<16x64xi1>, vector<16x64xf32>
    %57 = arith.truncf %48 : vector<16x64xf32> to vector<16x64xbf16>
    %cst_47 = arith.constant dense<0.000000e+00> : vector<16x64xf32>
    %58 = tpu.matmul %57, %3, %cst_47 {dimension_numbers = #tpu.dot_dimension_numbers<[1], [0], [0], [1], [0, 0, 1, 1], [], []>} : vector<16x64xbf16>, vector<64x64xbf16>, vector<16x64xf32> -> vector<16x64xf32>
    %59 = arith.addf %56, %58 : vector<16x64xf32>
    %60 = math.tanh %59 : vector<16x64xf32>
    %61 = arith.select %12, %60, %54 : vector<16x64xi1>, vector<16x64xf32>
    %c48_48 = arith.constant 48 : index
    %c0_49 = arith.constant 0 : index
    %62 = vector.load %arg5[%c48_48, %c0_49] : memref<128x64xf32, #tpu.memory_space<vmem>>, vector<16x64xf32>
    tpu.vector_store %arg5[%c48_48, %c0_49], %61 {strides = array<i32>} : memref<128x64xf32, #tpu.memory_space<vmem>>, vector<16x64xf32>,
    %c64_50 = arith.constant 64 : index
    %c0_51 = arith.constant 0 : index
    %63 = vector.load %arg5[%c64_50, %c0_51] : memref<128x64xf32, #tpu.memory_space<vmem>>, vector<16x64xf32>
    %64 = arith.select %12, %63, %60 : vector<16x64xi1>, vector<16x64xf32>
    %c64_52 = arith.constant 64 : index
    %c0_53 = arith.constant 0 : index
    %65 = vector.load %arg5[%c64_52, %c0_53] : memref<128x64xf32, #tpu.memory_space<vmem>>, vector<16x64xf32>
    tpu.vector_store %arg5[%c64_52, %c0_53], %64 {strides = array<i32>} : memref<128x64xf32, #tpu.memory_space<vmem>>, vector<16x64xf32>,
    %c64_54 = arith.constant 64 : index
    %c0_55 = arith.constant 0 : index
    %66 = vector.load %arg5[%c64_54, %c0_55] : memref<128x64xf32, #tpu.memory_space<vmem>>, vector<16x64xf32>
    %c48_56 = arith.constant 48 : index
    %c0_57 = arith.constant 0 : index
    %67 = vector.load %arg5[%c48_56, %c0_57] : memref<128x64xf32, #tpu.memory_space<vmem>>, vector<16x64xf32>
    %68 = arith.select %12, %66, %67 : vector<16x64xi1>, vector<16x64xf32>
    %69 = arith.truncf %60 : vector<16x64xf32> to vector<16x64xbf16>
    %cst_58 = arith.constant dense<0.000000e+00> : vector<16x64xf32>
    %70 = tpu.matmul %69, %3, %cst_58 {dimension_numbers = #tpu.dot_dimension_numbers<[1], [0], [0], [1], [0, 0, 1, 1], [], []>} : vector<16x64xbf16>, vector<64x64xbf16>, vector<16x64xf32> -> vector<16x64xf32>
    %71 = arith.addf %68, %70 : vector<16x64xf32>
    %72 = math.tanh %71 : vector<16x64xf32>
    %73 = arith.select %12, %72, %66 : vector<16x64xi1>, vector<16x64xf32>
    %c64_59 = arith.constant 64 : index
    %c0_60 = arith.constant 0 : index
    %74 = vector.load %arg5[%c64_59, %c0_60] : memref<128x64xf32, #tpu.memory_space<vmem>>, vector<16x64xf32>
    tpu.vector_store %arg5[%c64_59, %c0_60], %73 {strides = array<i32>} : memref<128x64xf32, #tpu.memory_space<vmem>>, vector<16x64xf32>,
    %c48_61 = arith.constant 48 : index
    %c0_62 = arith.constant 0 : index
    %75 = vector.load %arg5[%c48_61, %c0_62] : memref<128x64xf32, #tpu.memory_space<vmem>>, vector<16x64xf32>
    %76 = arith.select %12, %75, %72 : vector<16x64xi1>, vector<16x64xf32>
    %c48_63 = arith.constant 48 : index
    %c0_64 = arith.constant 0 : index
    %77 = vector.load %arg5[%c48_63, %c0_64] : memref<128x64xf32, #tpu.memory_space<vmem>>, vector<16x64xf32>
    tpu.vector_store %arg5[%c48_63, %c0_64], %76 {strides = array<i32>} : memref<128x64xf32, #tpu.memory_space<vmem>>, vector<16x64xf32>,
    %c80_65 = arith.constant 80 : index
    %c0_66 = arith.constant 0 : index
    %78 = vector.load %arg5[%c80_65, %c0_66] : memref<128x64xf32, #tpu.memory_space<vmem>>, vector<16x64xf32>
    %c32_67 = arith.constant 32 : index
    %c0_68 = arith.constant 0 : index
    %79 = vector.load %arg5[%c32_67, %c0_68] : memref<128x64xf32, #tpu.memory_space<vmem>>, vector<16x64xf32>
    %80 = arith.select %12, %78, %79 : vector<16x64xi1>, vector<16x64xf32>
    %81 = arith.truncf %72 : vector<16x64xf32> to vector<16x64xbf16>
    %cst_69 = arith.constant dense<0.000000e+00> : vector<16x64xf32>
    %82 = tpu.matmul %81, %3, %cst_69 {dimension_numbers = #tpu.dot_dimension_numbers<[1], [0], [0], [1], [0, 0, 1, 1], [], []>} : vector<16x64xbf16>, vector<64x64xbf16>, vector<16x64xf32> -> vector<16x64xf32>
    %83 = arith.addf %80, %82 : vector<16x64xf32>
    %84 = math.tanh %83 : vector<16x64xf32>
    %85 = arith.select %12, %84, %78 : vector<16x64xi1>, vector<16x64xf32>
    %c80_70 = arith.constant 80 : index
    %c0_71 = arith.constant 0 : index
    %86 = vector.load %arg5[%c80_70, %c0_71] : memref<128x64xf32, #tpu.memory_space<vmem>>, vector<16x64xf32>
    tpu.vector_store %arg5[%c80_70, %c0_71], %85 {strides = array<i32>} : memref<128x64xf32, #tpu.memory_space<vmem>>, vector<16x64xf32>,
    %c32_72 = arith.constant 32 : index
    %c0_73 = arith.constant 0 : index
    %87 = vector.load %arg5[%c32_72, %c0_73] : memref<128x64xf32, #tpu.memory_space<vmem>>, vector<16x64xf32>
    %88 = arith.select %12, %87, %84 : vector<16x64xi1>, vector<16x64xf32>
    %c32_74 = arith.constant 32 : index
    %c0_75 = arith.constant 0 : index
    %89 = vector.load %arg5[%c32_74, %c0_75] : memref<128x64xf32, #tpu.memory_space<vmem>>, vector<16x64xf32>
    tpu.vector_store %arg5[%c32_74, %c0_75], %88 {strides = array<i32>} : memref<128x64xf32, #tpu.memory_space<vmem>>, vector<16x64xf32>,
    %c96_76 = arith.constant 96 : index
    %c0_77 = arith.constant 0 : index
    %90 = vector.load %arg5[%c96_76, %c0_77] : memref<128x64xf32, #tpu.memory_space<vmem>>, vector<16x64xf32>
    %c16_78 = arith.constant 16 : index
    %c0_79 = arith.constant 0 : index
    %91 = vector.load %arg5[%c16_78, %c0_79] : memref<128x64xf32, #tpu.memory_space<vmem>>, vector<16x64xf32>
    %92 = arith.select %12, %90, %91 : vector<16x64xi1>, vector<16x64xf32>
    %93 = arith.truncf %84 : vector<16x64xf32> to vector<16x64xbf16>
    %cst_80 = arith.constant dense<0.000000e+00> : vector<16x64xf32>
    %94 = tpu.matmul %93, %3, %cst_80 {dimension_numbers = #tpu.dot_dimension_numbers<[1], [0], [0], [1], [0, 0, 1, 1], [], []>} : vector<16x64xbf16>, vector<64x64xbf16>, vector<16x64xf32> -> vector<16x64xf32>
    %95 = arith.addf %92, %94 : vector<16x64xf32>
    %96 = math.tanh %95 : vector<16x64xf32>
    %97 = arith.select %12, %96, %90 : vector<16x64xi1>, vector<16x64xf32>
    %c96_81 = arith.constant 96 : index
    %c0_82 = arith.constant 0 : index
    %98 = vector.load %arg5[%c96_81, %c0_82] : memref<128x64xf32, #tpu.memory_space<vmem>>, vector<16x64xf32>
    tpu.vector_store %arg5[%c96_81, %c0_82], %97 {strides = array<i32>} : memref<128x64xf32, #tpu.memory_space<vmem>>, vector<16x64xf32>,
    %c16_83 = arith.constant 16 : index
    %c0_84 = arith.constant 0 : index
    %99 = vector.load %arg5[%c16_83, %c0_84] : memref<128x64xf32, #tpu.memory_space<vmem>>, vector<16x64xf32>
    %100 = arith.select %12, %99, %96 : vector<16x64xi1>, vector<16x64xf32>
    %c16_85 = arith.constant 16 : index
    %c0_86 = arith.constant 0 : index
    %101 = vector.load %arg5[%c16_85, %c0_86] : memref<128x64xf32, #tpu.memory_space<vmem>>, vector<16x64xf32>
    tpu.vector_store %arg5[%c16_85, %c0_86], %100 {strides = array<i32>} : memref<128x64xf32, #tpu.memory_space<vmem>>, vector<16x64xf32>,
    %c112_87 = arith.constant 112 : index
    %c0_88 = arith.constant 0 : index
    %102 = vector.load %arg5[%c112_87, %c0_88] : memref<128x64xf32, #tpu.memory_space<vmem>>, vector<16x64xf32>
    %c0_89 = arith.constant 0 : index
    %c0_90 = arith.constant 0 : index
    %103 = vector.load %arg5[%c0_89, %c0_90] : memref<128x64xf32, #tpu.memory_space<vmem>>, vector<16x64xf32>
    %104 = arith.select %12, %102, %103 : vector<16x64xi1>, vector<16x64xf32>
    %105 = arith.truncf %96 : vector<16x64xf32> to vector<16x64xbf16>
    %cst_91 = arith.constant dense<0.000000e+00> : vector<16x64xf32>
    %106 = tpu.matmul %105, %3, %cst_91 {dimension_numbers = #tpu.dot_dimension_numbers<[1], [0], [0], [1], [0, 0, 1, 1], [], []>} : vector<16x64xbf16>, vector<64x64xbf16>, vector<16x64xf32> -> vector<16x64xf32>
    %107 = arith.addf %104, %106 : vector<16x64xf32>
    %108 = math.tanh %107 : vector<16x64xf32>
    %109 = arith.select %12, %108, %102 : vector<16x64xi1>, vector<16x64xf32>
    %c112_92 = arith.constant 112 : index
    %c0_93 = arith.constant 0 : index
    %110 = vector.load %arg5[%c112_92, %c0_93] : memref<128x64xf32, #tpu.memory_space<vmem>>, vector<16x64xf32>
    tpu.vector_store %arg5[%c112_92, %c0_93], %109 {strides = array<i32>} : memref<128x64xf32, #tpu.memory_space<vmem>>, vector<16x64xf32>,
    %c0_94 = arith.constant 0 : index
    %c0_95 = arith.constant 0 : index
    %111 = vector.load %arg5[%c0_94, %c0_95] : memref<128x64xf32, #tpu.memory_space<vmem>>, vector<16x64xf32>
    %112 = arith.select %12, %111, %108 : vector<16x64xi1>, vector<16x64xf32>
    %c0_96 = arith.constant 0 : index
    %c0_97 = arith.constant 0 : index
    %113 = vector.load %arg5[%c0_96, %c0_97] : memref<128x64xf32, #tpu.memory_space<vmem>>, vector<16x64xf32>
    tpu.vector_store %arg5[%c0_96, %c0_97], %112 {strides = array<i32>} : memref<128x64xf32, #tpu.memory_space<vmem>>, vector<16x64xf32>,
    %c0_98 = arith.constant 0 : index
    %c0_99 = arith.constant 0 : index
    %114 = vector.load %arg5[%c0_98, %c0_99] : memref<128x64xf32, #tpu.memory_space<vmem>>, vector<128x64xf32>
    %115 = arith.truncf %114 : vector<128x64xf32> to vector<128x64xbf16>
    %cst_100 = arith.constant dense<0.000000e+00> : vector<128x64xf32>
    %116 = tpu.matmul %115, %4, %cst_100 {dimension_numbers = #tpu.dot_dimension_numbers<[1], [0], [0], [1], [0, 0, 1, 1], [], []>} : vector<128x64xbf16>, vector<64x64xbf16>, vector<128x64xf32> -> vector<128x64xf32>
    %117 = vector.broadcast %8 : vector<1x64xf32> to vector<128x64xf32>
    %118 = arith.addf %116, %117 : vector<128x64xf32>
    %c0_101 = arith.constant 0 : index
    %c0_102 = arith.constant 0 : index
    %119 = vector.load %arg6[%c0_101, %c0_102] : memref<128x64xf32, #tpu.memory_space<vmem>>, vector<128x64xf32>
    tpu.vector_store %arg6[%c0_101, %c0_102], %118 {strides = array<i32>} : memref<128x64xf32, #tpu.memory_space<vmem>>, vector<128x64xf32>,
    %cst_103 = arith.constant 0.000000e+00 : f32
    %120 = vector.broadcast %cst_103 : f32 to vector<16x64xf32>
    %c0_104 = arith.constant 0 : index
    %c0_105 = arith.constant 0 : index
    %121 = vector.load %arg6[%c0_104, %c0_105] : memref<128x64xf32, #tpu.memory_space<vmem>>, vector<16x64xf32>
    %c112_106 = arith.constant 112 : index
    %c0_107 = arith.constant 0 : index
    %122 = vector.load %arg6[%c112_106, %c0_107] : memref<128x64xf32, #tpu.memory_space<vmem>>, vector<16x64xf32>
    %123 = arith.select %12, %121, %122 : vector<16x64xi1>, vector<16x64xf32>
    %124 = arith.truncf %120 : vector<16x64xf32> to vector<16x64xbf16>
    %cst_108 = arith.constant dense<0.000000e+00> : vector<16x64xf32>
    %125 = tpu.matmul %124, %5, %cst_108 {dimension_numbers = #tpu.dot_dimension_numbers<[1], [0], [0], [1], [0, 0, 1, 1], [], []>} : vector<16x64xbf16>, vector<64x64xbf16>, vector<16x64xf32> -> vector<16x64xf32>
    %126 = arith.addf %123, %125 : vector<16x64xf32>
    %127 = math.tanh %126 : vector<16x64xf32>
    %128 = arith.select %12, %127, %121 : vector<16x64xi1>, vector<16x64xf32>
    %c0_109 = arith.constant 0 : index
    %c0_110 = arith.constant 0 : index
    %129 = vector.load %arg6[%c0_109, %c0_110] : memref<128x64xf32, #tpu.memory_space<vmem>>, vector<16x64xf32>
    tpu.vector_store %arg6[%c0_109, %c0_110], %128 {strides = array<i32>} : memref<128x64xf32, #tpu.memory_space<vmem>>, vector<16x64xf32>,
    %c112_111 = arith.constant 112 : index
    %c0_112 = arith.constant 0 : index
    %130 = vector.load %arg6[%c112_111, %c0_112] : memref<128x64xf32, #tpu.memory_space<vmem>>, vector<16x64xf32>
    %131 = arith.select %12, %130, %127 : vector<16x64xi1>, vector<16x64xf32>
    %c112_113 = arith.constant 112 : index
    %c0_114 = arith.constant 0 : index
    %132 = vector.load %arg6[%c112_113, %c0_114] : memref<128x64xf32, #tpu.memory_space<vmem>>, vector<16x64xf32>
    tpu.vector_store %arg6[%c112_113, %c0_114], %131 {strides = array<i32>} : memref<128x64xf32, #tpu.memory_space<vmem>>, vector<16x64xf32>,
    %c16_115 = arith.constant 16 : index
    %c0_116 = arith.constant 0 : index
    %133 = vector.load %arg6[%c16_115, %c0_116] : memref<128x64xf32, #tpu.memory_space<vmem>>, vector<16x64xf32>
    %c96_117 = arith.constant 96 : index
    %c0_118 = arith.constant 0 : index
    %134 = vector.load %arg6[%c96_117, %c0_118] : memref<128x64xf32, #tpu.memory_space<vmem>>, vector<16x64xf32>
    %135 = arith.select %12, %133, %134 : vector<16x64xi1>, vector<16x64xf32>
    %136 = arith.truncf %127 : vector<16x64xf32> to vector<16x64xbf16>
    %cst_119 = arith.constant dense<0.000000e+00> : vector<16x64xf32>
    %137 = tpu.matmul %136, %5, %cst_119 {dimension_numbers = #tpu.dot_dimension_numbers<[1], [0], [0], [1], [0, 0, 1, 1], [], []>} : vector<16x64xbf16>, vector<64x64xbf16>, vector<16x64xf32> -> vector<16x64xf32>
    %138 = arith.addf %135, %137 : vector<16x64xf32>
    %139 = math.tanh %138 : vector<16x64xf32>
    %140 = arith.select %12, %139, %133 : vector<16x64xi1>, vector<16x64xf32>
    %c16_120 = arith.constant 16 : index
    %c0_121 = arith.constant 0 : index
    %141 = vector.load %arg6[%c16_120, %c0_121] : memref<128x64xf32, #tpu.memory_space<vmem>>, vector<16x64xf32>
    tpu.vector_store %arg6[%c16_120, %c0_121], %140 {strides = array<i32>} : memref<128x64xf32, #tpu.memory_space<vmem>>, vector<16x64xf32>,
    %c96_122 = arith.constant 96 : index
    %c0_123 = arith.constant 0 : index
    %142 = vector.load %arg6[%c96_122, %c0_123] : memref<128x64xf32, #tpu.memory_space<vmem>>, vector<16x64xf32>
    %143 = arith.select %12, %142, %139 : vector<16x64xi1>, vector<16x64xf32>
    %c96_124 = arith.constant 96 : index
    %c0_125 = arith.constant 0 : index
    %144 = vector.load %arg6[%c96_124, %c0_125] : memref<128x64xf32, #tpu.memory_space<vmem>>, vector<16x64xf32>
    tpu.vector_store %arg6[%c96_124, %c0_125], %143 {strides = array<i32>} : memref<128x64xf32, #tpu.memory_space<vmem>>, vector<16x64xf32>,
    %c32_126 = arith.constant 32 : index
    %c0_127 = arith.constant 0 : index
    %145 = vector.load %arg6[%c32_126, %c0_127] : memref<128x64xf32, #tpu.memory_space<vmem>>, vector<16x64xf32>
    %c80_128 = arith.constant 80 : index
    %c0_129 = arith.constant 0 : index
    %146 = vector.load %arg6[%c80_128, %c0_129] : memref<128x64xf32, #tpu.memory_space<vmem>>, vector<16x64xf32>
    %147 = arith.select %12, %145, %146 : vector<16x64xi1>, vector<16x64xf32>
    %148 = arith.truncf %139 : vector<16x64xf32> to vector<16x64xbf16>
    %cst_130 = arith.constant dense<0.000000e+00> : vector<16x64xf32>
    %149 = tpu.matmul %148, %5, %cst_130 {dimension_numbers = #tpu.dot_dimension_numbers<[1], [0], [0], [1], [0, 0, 1, 1], [], []>} : vector<16x64xbf16>, vector<64x64xbf16>, vector<16x64xf32> -> vector<16x64xf32>
    %150 = arith.addf %147, %149 : vector<16x64xf32>
    %151 = math.tanh %150 : vector<16x64xf32>
    %152 = arith.select %12, %151, %145 : vector<16x64xi1>, vector<16x64xf32>
    %c32_131 = arith.constant 32 : index
    %c0_132 = arith.constant 0 : index
    %153 = vector.load %arg6[%c32_131, %c0_132] : memref<128x64xf32, #tpu.memory_space<vmem>>, vector<16x64xf32>
    tpu.vector_store %arg6[%c32_131, %c0_132], %152 {strides = array<i32>} : memref<128x64xf32, #tpu.memory_space<vmem>>, vector<16x64xf32>,
    %c80_133 = arith.constant 80 : index
    %c0_134 = arith.constant 0 : index
    %154 = vector.load %arg6[%c80_133, %c0_134] : memref<128x64xf32, #tpu.memory_space<vmem>>, vector<16x64xf32>
    %155 = arith.select %12, %154, %151 : vector<16x64xi1>, vector<16x64xf32>
    %c80_135 = arith.constant 80 : index
    %c0_136 = arith.constant 0 : index
    %156 = vector.load %arg6[%c80_135, %c0_136] : memref<128x64xf32, #tpu.memory_space<vmem>>, vector<16x64xf32>
    tpu.vector_store %arg6[%c80_135, %c0_136], %155 {strides = array<i32>} : memref<128x64xf32, #tpu.memory_space<vmem>>, vector<16x64xf32>,
    %c48_137 = arith.constant 48 : index
    %c0_138 = arith.constant 0 : index
    %157 = vector.load %arg6[%c48_137, %c0_138] : memref<128x64xf32, #tpu.memory_space<vmem>>, vector<16x64xf32>
    %c64_139 = arith.constant 64 : index
    %c0_140 = arith.constant 0 : index
    %158 = vector.load %arg6[%c64_139, %c0_140] : memref<128x64xf32, #tpu.memory_space<vmem>>, vector<16x64xf32>
    %159 = arith.select %12, %157, %158 : vector<16x64xi1>, vector<16x64xf32>
    %160 = arith.truncf %151 : vector<16x64xf32> to vector<16x64xbf16>
    %cst_141 = arith.constant dense<0.000000e+00> : vector<16x64xf32>
    %161 = tpu.matmul %160, %5, %cst_141 {dimension_numbers = #tpu.dot_dimension_numbers<[1], [0], [0], [1], [0, 0, 1, 1], [], []>} : vector<16x64xbf16>, vector<64x64xbf16>, vector<16x64xf32> -> vector<16x64xf32>
    %162 = arith.addf %159, %161 : vector<16x64xf32>
    %163 = math.tanh %162 : vector<16x64xf32>
    %164 = arith.select %12, %163, %157 : vector<16x64xi1>, vector<16x64xf32>
    %c48_142 = arith.constant 48 : index
    %c0_143 = arith.constant 0 : index
    %165 = vector.load %arg6[%c48_142, %c0_143] : memref<128x64xf32, #tpu.memory_space<vmem>>, vector<16x64xf32>
    tpu.vector_store %arg6[%c48_142, %c0_143], %164 {strides = array<i32>} : memref<128x64xf32, #tpu.memory_space<vmem>>, vector<16x64xf32>,
    %c64_144 = arith.constant 64 : index
    %c0_145 = arith.constant 0 : index
    %166 = vector.load %arg6[%c64_144, %c0_145] : memref<128x64xf32, #tpu.memory_space<vmem>>, vector<16x64xf32>
    %167 = arith.select %12, %166, %163 : vector<16x64xi1>, vector<16x64xf32>
    %c64_146 = arith.constant 64 : index
    %c0_147 = arith.constant 0 : index
    %168 = vector.load %arg6[%c64_146, %c0_147] : memref<128x64xf32, #tpu.memory_space<vmem>>, vector<16x64xf32>
    tpu.vector_store %arg6[%c64_146, %c0_147], %167 {strides = array<i32>} : memref<128x64xf32, #tpu.memory_space<vmem>>, vector<16x64xf32>,
    %c64_148 = arith.constant 64 : index
    %c0_149 = arith.constant 0 : index
    %169 = vector.load %arg6[%c64_148, %c0_149] : memref<128x64xf32, #tpu.memory_space<vmem>>, vector<16x64xf32>
    %c48_150 = arith.constant 48 : index
    %c0_151 = arith.constant 0 : index
    %170 = vector.load %arg6[%c48_150, %c0_151] : memref<128x64xf32, #tpu.memory_space<vmem>>, vector<16x64xf32>
    %171 = arith.select %12, %169, %170 : vector<16x64xi1>, vector<16x64xf32>
    %172 = arith.truncf %163 : vector<16x64xf32> to vector<16x64xbf16>
    %cst_152 = arith.constant dense<0.000000e+00> : vector<16x64xf32>
    %173 = tpu.matmul %172, %5, %cst_152 {dimension_numbers = #tpu.dot_dimension_numbers<[1], [0], [0], [1], [0, 0, 1, 1], [], []>} : vector<16x64xbf16>, vector<64x64xbf16>, vector<16x64xf32> -> vector<16x64xf32>
    %174 = arith.addf %171, %173 : vector<16x64xf32>
    %175 = math.tanh %174 : vector<16x64xf32>
    %176 = arith.select %12, %175, %169 : vector<16x64xi1>, vector<16x64xf32>
    %c64_153 = arith.constant 64 : index
    %c0_154 = arith.constant 0 : index
    %177 = vector.load %arg6[%c64_153, %c0_154] : memref<128x64xf32, #tpu.memory_space<vmem>>, vector<16x64xf32>
    tpu.vector_store %arg6[%c64_153, %c0_154], %176 {strides = array<i32>} : memref<128x64xf32, #tpu.memory_space<vmem>>, vector<16x64xf32>,
    %c48_155 = arith.constant 48 : index
    %c0_156 = arith.constant 0 : index
    %178 = vector.load %arg6[%c48_155, %c0_156] : memref<128x64xf32, #tpu.memory_space<vmem>>, vector<16x64xf32>
    %179 = arith.select %12, %178, %175 : vector<16x64xi1>, vector<16x64xf32>
    %c48_157 = arith.constant 48 : index
    %c0_158 = arith.constant 0 : index
    %180 = vector.load %arg6[%c48_157, %c0_158] : memref<128x64xf32, #tpu.memory_space<vmem>>, vector<16x64xf32>
    tpu.vector_store %arg6[%c48_157, %c0_158], %179 {strides = array<i32>} : memref<128x64xf32, #tpu.memory_space<vmem>>, vector<16x64xf32>,
    %c80_159 = arith.constant 80 : index
    %c0_160 = arith.constant 0 : index
    %181 = vector.load %arg6[%c80_159, %c0_160] : memref<128x64xf32, #tpu.memory_space<vmem>>, vector<16x64xf32>
    %c32_161 = arith.constant 32 : index
    %c0_162 = arith.constant 0 : index
    %182 = vector.load %arg6[%c32_161, %c0_162] : memref<128x64xf32, #tpu.memory_space<vmem>>, vector<16x64xf32>
    %183 = arith.select %12, %181, %182 : vector<16x64xi1>, vector<16x64xf32>
    %184 = arith.truncf %175 : vector<16x64xf32> to vector<16x64xbf16>
    %cst_163 = arith.constant dense<0.000000e+00> : vector<16x64xf32>
    %185 = tpu.matmul %184, %5, %cst_163 {dimension_numbers = #tpu.dot_dimension_numbers<[1], [0], [0], [1], [0, 0, 1, 1], [], []>} : vector<16x64xbf16>, vector<64x64xbf16>, vector<16x64xf32> -> vector<16x64xf32>
    %186 = arith.addf %183, %185 : vector<16x64xf32>
    %187 = math.tanh %186 : vector<16x64xf32>
    %188 = arith.select %12, %187, %181 : vector<16x64xi1>, vector<16x64xf32>
    %c80_164 = arith.constant 80 : index
    %c0_165 = arith.constant 0 : index
    %189 = vector.load %arg6[%c80_164, %c0_165] : memref<128x64xf32, #tpu.memory_space<vmem>>, vector<16x64xf32>
    tpu.vector_store %arg6[%c80_164, %c0_165], %188 {strides = array<i32>} : memref<128x64xf32, #tpu.memory_space<vmem>>, vector<16x64xf32>,
    %c32_166 = arith.constant 32 : index
    %c0_167 = arith.constant 0 : index
    %190 = vector.load %arg6[%c32_166, %c0_167] : memref<128x64xf32, #tpu.memory_space<vmem>>, vector<16x64xf32>
    %191 = arith.select %12, %190, %187 : vector<16x64xi1>, vector<16x64xf32>
    %c32_168 = arith.constant 32 : index
    %c0_169 = arith.constant 0 : index
    %192 = vector.load %arg6[%c32_168, %c0_169] : memref<128x64xf32, #tpu.memory_space<vmem>>, vector<16x64xf32>
    tpu.vector_store %arg6[%c32_168, %c0_169], %191 {strides = array<i32>} : memref<128x64xf32, #tpu.memory_space<vmem>>, vector<16x64xf32>,
    %c96_170 = arith.constant 96 : index
    %c0_171 = arith.constant 0 : index
    %193 = vector.load %arg6[%c96_170, %c0_171] : memref<128x64xf32, #tpu.memory_space<vmem>>, vector<16x64xf32>
    %c16_172 = arith.constant 16 : index
    %c0_173 = arith.constant 0 : index
    %194 = vector.load %arg6[%c16_172, %c0_173] : memref<128x64xf32, #tpu.memory_space<vmem>>, vector<16x64xf32>
    %195 = arith.select %12, %193, %194 : vector<16x64xi1>, vector<16x64xf32>
    %196 = arith.truncf %187 : vector<16x64xf32> to vector<16x64xbf16>
    %cst_174 = arith.constant dense<0.000000e+00> : vector<16x64xf32>
    %197 = tpu.matmul %196, %5, %cst_174 {dimension_numbers = #tpu.dot_dimension_numbers<[1], [0], [0], [1], [0, 0, 1, 1], [], []>} : vector<16x64xbf16>, vector<64x64xbf16>, vector<16x64xf32> -> vector<16x64xf32>
    %198 = arith.addf %195, %197 : vector<16x64xf32>
    %199 = math.tanh %198 : vector<16x64xf32>
    %200 = arith.select %12, %199, %193 : vector<16x64xi1>, vector<16x64xf32>
    %c96_175 = arith.constant 96 : index
    %c0_176 = arith.constant 0 : index
    %201 = vector.load %arg6[%c96_175, %c0_176] : memref<128x64xf32, #tpu.memory_space<vmem>>, vector<16x64xf32>
    tpu.vector_store %arg6[%c96_175, %c0_176], %200 {strides = array<i32>} : memref<128x64xf32, #tpu.memory_space<vmem>>, vector<16x64xf32>,
    %c16_177 = arith.constant 16 : index
    %c0_178 = arith.constant 0 : index
    %202 = vector.load %arg6[%c16_177, %c0_178] : memref<128x64xf32, #tpu.memory_space<vmem>>, vector<16x64xf32>
    %203 = arith.select %12, %202, %199 : vector<16x64xi1>, vector<16x64xf32>
    %c16_179 = arith.constant 16 : index
    %c0_180 = arith.constant 0 : index
    %204 = vector.load %arg6[%c16_179, %c0_180] : memref<128x64xf32, #tpu.memory_space<vmem>>, vector<16x64xf32>
    tpu.vector_store %arg6[%c16_179, %c0_180], %203 {strides = array<i32>} : memref<128x64xf32, #tpu.memory_space<vmem>>, vector<16x64xf32>,
    %c112_181 = arith.constant 112 : index
    %c0_182 = arith.constant 0 : index
    %205 = vector.load %arg6[%c112_181, %c0_182] : memref<128x64xf32, #tpu.memory_space<vmem>>, vector<16x64xf32>
    %c0_183 = arith.constant 0 : index
    %c0_184 = arith.constant 0 : index
    %206 = vector.load %arg6[%c0_183, %c0_184] : memref<128x64xf32, #tpu.memory_space<vmem>>, vector<16x64xf32>
    %207 = arith.select %12, %205, %206 : vector<16x64xi1>, vector<16x64xf32>
    %208 = arith.truncf %199 : vector<16x64xf32> to vector<16x64xbf16>
    %cst_185 = arith.constant dense<0.000000e+00> : vector<16x64xf32>
    %209 = tpu.matmul %208, %5, %cst_185 {dimension_numbers = #tpu.dot_dimension_numbers<[1], [0], [0], [1], [0, 0, 1, 1], [], []>} : vector<16x64xbf16>, vector<64x64xbf16>, vector<16x64xf32> -> vector<16x64xf32>
    %210 = arith.addf %207, %209 : vector<16x64xf32>
    %211 = math.tanh %210 : vector<16x64xf32>
    %212 = arith.select %12, %211, %205 : vector<16x64xi1>, vector<16x64xf32>
    %c112_186 = arith.constant 112 : index
    %c0_187 = arith.constant 0 : index
    %213 = vector.load %arg6[%c112_186, %c0_187] : memref<128x64xf32, #tpu.memory_space<vmem>>, vector<16x64xf32>
    tpu.vector_store %arg6[%c112_186, %c0_187], %212 {strides = array<i32>} : memref<128x64xf32, #tpu.memory_space<vmem>>, vector<16x64xf32>,
    %c0_188 = arith.constant 0 : index
    %c0_189 = arith.constant 0 : index
    %214 = vector.load %arg6[%c0_188, %c0_189] : memref<128x64xf32, #tpu.memory_space<vmem>>, vector<16x64xf32>
    %215 = arith.select %12, %214, %211 : vector<16x64xi1>, vector<16x64xf32>
    %c0_190 = arith.constant 0 : index
    %c0_191 = arith.constant 0 : index
    %216 = vector.load %arg6[%c0_190, %c0_191] : memref<128x64xf32, #tpu.memory_space<vmem>>, vector<16x64xf32>
    tpu.vector_store %arg6[%c0_190, %c0_191], %215 {strides = array<i32>} : memref<128x64xf32, #tpu.memory_space<vmem>>, vector<16x64xf32>,
    %c0_192 = arith.constant 0 : index
    %c0_193 = arith.constant 0 : index
    %217 = vector.load %arg6[%c0_192, %c0_193] : memref<128x64xf32, #tpu.memory_space<vmem>>, vector<128x64xf32>
    %218 = arith.truncf %217 : vector<128x64xf32> to vector<128x64xbf16>
    %cst_194 = arith.constant dense<0.000000e+00> : vector<128x32xf32>
    %219 = tpu.matmul %218, %6, %cst_194 {dimension_numbers = #tpu.dot_dimension_numbers<[1], [0], [0], [1], [0, 0, 1, 1], [], []>} : vector<128x64xbf16>, vector<64x32xbf16>, vector<128x32xf32> -> vector<128x32xf32>
    %220 = vector.broadcast %9 : vector<1x32xf32> to vector<128x32xf32>
    %221 = arith.addf %219, %220 : vector<128x32xf32>
    %222 = vector.shape_cast %221 : vector<128x32xf32> to vector<8x16x32xf32>
    %cst_195 = arith.constant dense<0xFF800000> : vector<16x32xf32>
    %223 = vector.multi_reduction <maximumf>, %222, %cst_195 [0] : vector<8x16x32xf32> to vector<16x32xf32>
    %c0_196 = arith.constant 0 : index
    %c0_197 = arith.constant 0 : index
    %224 = vector.load %arg4[%c0_196, %c0_197] : memref<16x32xf32, #tpu.memory_space<vmem>>, vector<16x32xf32>
    tpu.vector_store %arg4[%c0_196, %c0_197], %223 {strides = array<i32>} : memref<16x32xf32, #tpu.memory_space<vmem>>, vector<16x32xf32>,
    return
  }
  func.func @transform_0(%arg0: i32) -> (i32, i32, i32) {
    %c0_i32 = arith.constant 0 : i32
    %c0_i32_0 = arith.constant 0 : i32
    %c0_i32_1 = arith.constant 0 : i32
    return %arg0, %c0_i32, %c0_i32_0 : i32, i32, i32
  }
  func.func @transform_1(%arg0: i32) -> (i32, i32) {
    %c0_i32 = arith.constant 0 : i32
    %c0_i32_0 = arith.constant 0 : i32
    %c0_i32_1 = arith.constant 0 : i32
    return %c0_i32, %c0_i32_0 : i32, i32
  }
  func.func @transform_2(%arg0: i32) -> (i32, i32) {
    %c0_i32 = arith.constant 0 : i32
    %c0_i32_0 = arith.constant 0 : i32
    %c0_i32_1 = arith.constant 0 : i32
    return %c0_i32, %c0_i32_0 : i32, i32
  }
  func.func @transform_3(%arg0: i32) -> (i32, i32) {
    %c0_i32 = arith.constant 0 : i32
    %c0_i32_0 = arith.constant 0 : i32
    return %arg0, %c0_i32 : i32, i32
  }
}

</mosaic_0001>

<bundles_post_ra>
// kernel: sentence_encoder.1
= control target key start
LH: loop header
LB: loop body
LE: loop exit
PB: predicated region body
PF: predicated region fallthrough
CT: control target
= control target key end

     0   :  { %vm126_vm0 = vcmask 261120   ;;  %v1408_v12 = vmov 0   ;;  %vm200_vm1 = vcmask 523264   ;;  %v70_v46 = vlaneseq  ;;  %s1951_s1 = inlined_call_operand.vmem [shape: bf16[288,64], index: 1, kind: input, shape index: {}]   ;;  %s1952_s2 = inlined_call_operand.vmem [shape: f32[8,64], index: 2, kind: input, shape index: {}]   ;;  %s1953_s0 = inlined_call_operand.vmem [shape: bf16[1,128,32], index: 0, kind: input, shape index: {}]   ;;  %s1954_s3 = inlined_call_operand.vmem [shape: f32[16,32], index: 3, kind: output, shape index: {}]  }
   0x1   :  { %v1315_v0 = vld [vmem:[%s1951_s1 + $0x8] sm:$0xff]  ;;  %v1314_v1 = vld [vmem:[%s1951_s1] sm:$0xff]  ;;  %v1308_v4 = vld [vmem:[%s1953_s0 + $0x10] sm:$0xff] }
   0x2   :  { %157 = vmatpush.bf16.msra.mxu0 %v1315_v0  ;;  %v1306_v2 = vld [vmem:[%s1953_s0] sm:$0xff]  ;;  %v1307_v3 = vld [vmem:[%s1953_s0 + $0x8] sm:$0xff]  ;;  %v1309_v5 = vld [vmem:[%s1953_s0 + $0x18] sm:$0xff]  ;;  %v1534_v47 = vand.u32 127, %v70_v46 }
   0x3   :  { %v1310_v6 = vld [vmem:[%s1953_s0 + $0x20] sm:$0xff]  ;;  %v1458_v7 = vld [vmem:[%s1951_s1 + $0x28] sm:$0xff]  ;;  %v1472_v9 = vld [vmem:[%s1951_s1 + $0x18] sm:$0xff] }
   0x4   :  { %254 = vmatpush.bf16.msra.mxu1 %v1458_v7  ;;  %v1464_v8 = vld [vmem:[%s1951_s1 + $0x20] sm:$0xff]  ;;  %292 = vmatpush.bf16.msra.mxu2 %v1458_v7  ;;  %v1311_v10 = vld [vmem:[%s1953_s0 + $0x28] sm:$0xff]  ;;  %v1485_v11 = vld [vmem:[%s1951_s1 + $0x10] sm:$0xff]  ;;  %vm72_vm2 = vcmp.lt.s32.totalorder %v1534_v47, 32 }
   0x5   :  { %330 = vmatpush.bf16.msra.mxu3 %v1458_v7  ;;  %v1312_v13 = vld [vmem:[%s1953_s0 + $0x30] sm:$0xff]  ;;  %v1313_v14 = vld [vmem:[%s1953_s0 + $0x38] sm:$0xff]  ;;  %v1341_v15 = vld [vmem:[%s1952_s2] ss:$0 sm:$0xff] }
   0x6   :  { %158 = vmatpush.bf16.msra.mxu0 %v1314_v1 }
   0x8   :  { %255 = vmatpush.bf16.msra.mxu1 %v1464_v8  ;;  %293 = vmatpush.bf16.msra.mxu2 %v1464_v8 }
   0x9   :  { %1204 = vmatmul.msk.bf16.vlgmr.msra.gmra.mxu0 %vm126_vm0, %v1306_v2  ;;  %331 = vmatpush.bf16.msra.mxu3 %v1464_v8 }
   0xc   :  { %256 = vmatpush.bf16.msra.mxu1 %v1472_v9  ;;  %294 = vmatpush.bf16.msra.mxu2 %v1472_v9 }
   0xd   :  { %332 = vmatpush.bf16.msra.mxu3 %v1472_v9 }
  0x10   :  { %257 = vmatpush.bf16.msra.mxu1 %v1485_v11  ;;  %295 = vmatpush.bf16.msra.mxu2 %v1485_v11 }
  0x11   :  { %333 = vmatpush.bf16.msra.mxu3 %v1485_v11 }
  0x13   :  { %258 = vmatmul.bf16.vlgmr.msra.gmra.mxu1 %v1408_v12 }
  0x14   :  { %368 = vmatpush.bf16.msrb.mxu1 %v1458_v7  ;;  %406 = vmatpush.bf16.msrb.mxu2 %v1458_v7 }
  0x15   :  { %444 = vmatpush.bf16.msrb.mxu3 %v1458_v7 }
  0x18   :  { %369 = vmatpush.bf16.msrb.mxu1 %v1464_v8  ;;  %407 = vmatpush.bf16.msrb.mxu2 %v1464_v8 }
  0x19   :  { %1205 = vmatmul.msk.bf16.gmra.mxu0 %vm126_vm0, %v1307_v3  ;;  %445 = vmatpush.bf16.msrb.mxu3 %v1464_v8 }
  0x1c   :  { %370 = vmatpush.bf16.msrb.mxu1 %v1472_v9  ;;  %408 = vmatpush.bf16.msrb.mxu2 %v1472_v9 }
  0x1d   :  { %446 = vmatpush.bf16.msrb.mxu3 %v1472_v9 }
  0x20   :  { %371 = vmatpush.bf16.msrb.mxu1 %v1485_v11  ;;  %409 = vmatpush.bf16.msrb.mxu2 %v1485_v11 }
  0x21   :  { %447 = vmatpush.bf16.msrb.mxu3 %v1485_v11 }
  0x24   :  { %482 = vmatpush.bf16.msra.mxu1 %v1458_v7 }
  0x28   :  { %483 = vmatpush.bf16.msra.mxu1 %v1464_v8 }
  0x29   :  { %1206 = vmatmul.msk.bf16.gmra.mxu0 %vm126_vm0, %v1308_v4 }
  0x2c   :  { %484 = vmatpush.bf16.msra.mxu1 %v1472_v9 }
  0x30   :  { %485 = vmatpush.bf16.msra.mxu1 %v1485_v11 }
  0x39   :  { %1207 = vmatmul.msk.bf16.gmra.mxu0 %vm126_vm0, %v1309_v5 }
  0x49   :  { %1208 = vmatmul.msk.bf16.gmra.mxu0 %vm126_vm0, %v1310_v6 }
  0x59   :  { %1209 = vmatmul.msk.bf16.gmra.mxu0 %vm126_vm0, %v1311_v10 }
  0x69   :  { %1210 = vmatmul.msk.bf16.gmra.mxu0 %vm126_vm0, %v1312_v13 }
  0x79   :  { %1211 = vmatmul.msk.bf16.gmra.mxu0 %vm126_vm0, %v1313_v14 }
  0x86   :  { %v160_v16 = vpop.f32.mrf.mxu0 }
  0x87   :  { %v161_v17 = vadd.f32 %v1341_v15, %v160_v16 }
  0x89   :  { %201 = vst.msk [vmem:[#allocation2] sm:$0xff] %vm200_vm1, %v161_v17 }
  0x8e   :  { %v162_v18 = vpop.f32.mrf.mxu0 }
  0x8f   :  { %v163_v19 = vadd.f32 %v1341_v15, %v162_v18 }
  0x90   :  { %v259_v49 = vpop.f32.mrf.mxu1  ;;  %v217_v51 = vld [vmem:[#allocation2] sm:$0xff] }
  0x91   :  { %202 = vst.msk [vmem:[#allocation2 + $0x8] sm:$0xff] %vm200_vm1, %v163_v19 }
  0x96   :  { %v165_v20 = vpop.f32.mrf.mxu0 }
  0x97   :  { %v166_v21 = vadd.f32 %v1341_v15, %v165_v20 }
  0x98   :  { %v218_v55 = vld [vmem:[#allocation2 + $0x8] sm:$0xff]  ;;  %v261_v58 = vpop.f32.mrf.mxu1 }
  0x99   :  { %203 = vst.msk [vmem:[#allocation2 + $0x10] sm:$0xff] %vm200_vm1, %v166_v21 }
  0x9e   :  { %v167_v22 = vpop.f32.mrf.mxu0 }
  0x9f   :  { %v168_v23 = vadd.f32 %v1341_v15, %v167_v22 }
  0xa0   :  { %v278_v4 = vld [vmem:[#allocation2 + $0x10] sm:$0xff] }
  0xa1   :  { %204 = vst.msk [vmem:[#allocation2 + $0x18] sm:$0xff] %vm200_vm1, %v168_v23 }
  0xa6   :  { %v170_v24 = vpop.f32.mrf.mxu0 }
  0xa7   :  { %v171_v25 = vadd.f32 %v1341_v15, %v170_v24 }
  0xa8   :  { %v279_v14 = vld [vmem:[#allocation2 + $0x18] sm:$0xff] }
  0xa9   :  { %205 = vst.msk [vmem:[#allocation2 + $0x20] sm:$0xff] %vm200_vm1, %v171_v25 }
  0xae   :  { %v172_v26 = vpop.f32.mrf.mxu0 }
  0xaf   :  { %v173_v27 = vadd.f32 %v1341_v15, %v172_v26 }
  0xb0   :  { %v316_v22 = vld [vmem:[#allocation2 + $0x20] sm:$0xff] }
  0xb1   :  { %206 = vst.msk [vmem:[#allocation2 + $0x28] sm:$0xff] %vm200_vm1, %v173_v27 }
  0xb6   :  { %v175_v28 = vpop.f32.mrf.mxu0 }
  0xb7   :  { %v176_v29 = vadd.f32 %v1341_v15, %v175_v28 }
  0xb8   :  { %v317_v27 = vld [vmem:[#allocation2 + $0x28] sm:$0xff] }
  0xb9   :  { %207 = vst.msk [vmem:[#allocation2 + $0x30] sm:$0xff] %vm200_vm1, %v176_v29 }
  0xbe   :  { %v177_v30 = vpop.f32.mrf.mxu0 }
  0xbf   :  { %v178_v31 = vadd.f32 %v1341_v15, %v177_v30 }
  0xc1   :  { %208 = vst.msk [vmem:[#allocation2 + $0x38] sm:$0xff] %vm200_vm1, %v178_v31 }
  0xc6   :  { %v180_v32 = vpop.f32.mrf.mxu0 }
  0xc7   :  { %v181_v33 = vadd.f32 %v1341_v15, %v180_v32 }
  0xc9   :  { %209 = vst.msk [vmem:[#allocation2 + $0x40] sm:$0xff] %vm200_vm1, %v181_v33 }
  0xce   :  { %v182_v34 = vpop.f32.mrf.mxu0 }
  0xcf   :  { %v183_v35 = vadd.f32 %v1341_v15, %v182_v34 }
  0xd1   :  { %210 = vst.msk [vmem:[#allocation2 + $0x48] sm:$0xff] %vm200_vm1, %v183_v35 }
  0xd6   :  { %v185_v36 = vpop.f32.mrf.mxu0 }
  0xd7   :  { %v186_v37 = vadd.f32 %v1341_v15, %v185_v36 }
  0xd9   :  { %211 = vst.msk [vmem:[#allocation2 + $0x50] sm:$0xff] %vm200_vm1, %v186_v37 }
  0xde   :  { %v187_v38 = vpop.f32.mrf.mxu0 }
  0xdf   :  { %v188_v39 = vadd.f32 %v1341_v15, %v187_v38  ;;  %v356_v38 = vld [vmem:[#allocation2 + $0x40] sm:$0xff] }
  0xe0   :  { %v318_v21 = vld [vmem:[#allocation2 + $0x50] sm:$0xff] }
  0xe1   :  { %212 = vst.msk [vmem:[#allocation2 + $0x58] sm:$0xff] %vm200_vm1, %v188_v39  ;;  %v320_v23 = vsel %vm72_vm2, %v316_v22, %v318_v21  ;;  %v354_v39 = vld [vmem:[#allocation2 + $0x30] sm:$0xff] }
  0xe6   :  { %v190_v40 = vpop.f32.mrf.mxu0 }
  0xe7   :  { %v191_v41 = vadd.f32 %v1341_v15, %v190_v40  ;;  %v358_v40 = vsel %vm72_vm2, %v354_v39, %v356_v38 }
  0xe8   :  { %v319_v26 = vld [vmem:[#allocation2 + $0x58] sm:$0xff] }
  0xe9   :  { %213 = vst.msk [vmem:[#allocation2 + $0x60] sm:$0xff] %vm200_vm1, %v191_v41  ;;  %v321_v28 = vsel %vm72_vm2, %v317_v27, %v319_v26 }
  0xee   :  { %v192_v42 = vpop.f32.mrf.mxu0 }
  0xef   :  { %v193_v43 = vadd.f32 %v1341_v15, %v192_v42 }
  0xf0   :  { %v280_v3 = vld [vmem:[#allocation2 + $0x60] sm:$0xff] }
  0xf1   :  { %214 = vst.msk [vmem:[#allocation2 + $0x68] sm:$0xff] %vm200_vm1, %v193_v43  ;;  %v282_v5 = vsel %vm72_vm2, %v278_v4, %v280_v3  ;;  %v357_v43 = vld [vmem:[#allocation2 + $0x48] sm:$0xff] }
  0xf6   :  { %v195_v44 = vpop.f32.mrf.mxu0 }
  0xf7   :  { %v196_v45 = vadd.f32 %v1341_v15, %v195_v44  ;;  %v355_v44 = vld [vmem:[#allocation2 + $0x38] sm:$0xff] }
  0xf8   :  { %v281_v13 = vld [vmem:[#allocation2 + $0x68] sm:$0xff] }
  0xf9   :  { %215 = vst.msk [vmem:[#allocation2 + $0x70] sm:$0xff] %vm200_vm1, %v196_v45  ;;  %v359_v45 = vsel %vm72_vm2, %v355_v44, %v357_v43 }
  0xfe   :  { %v197_v48 = vpop.f32.mrf.mxu0 }
  0xff   :  { %v198_v50 = vadd.f32 %v1341_v15, %v197_v48  ;;  %v283_v15 = vsel %vm72_vm2, %v279_v14, %v281_v13 }
 0x100   :  { %v219_v52 = vld [vmem:[#allocation2 + $0x70] sm:$0xff] }
 0x101   :  { %v221_v53 = vsel %vm72_vm2, %v217_v51, %v219_v52  ;;  %216 = vst.msk [vmem:[#allocation2 + $0x78] sm:$0xff] %vm200_vm1, %v198_v50 }
 0x102   :  { %v264_v54 = vadd.f32 %v259_v49, %v221_v53 }
 0x104   :  { %1344 = vtanh.f32 %v264_v54 }
 0x108   :  { %v220_v56 = vld [vmem:[#allocation2 + $0x78] sm:$0xff] }
 0x109   :  { %v222_v57 = vsel %vm72_vm2, %v218_v55, %v220_v56 }
 0x10a   :  { %v1345_v59 = vpop.eup %1344  ;;  %v265_v60 = vadd.f32 %v261_v58, %v222_v57 }
 0x10b   :  { %v268_v61 = vsel %vm72_vm2, %v1345_v59, %v217_v51  ;;  %v274_v62 = vsel %vm72_vm2, %v219_v52, %v1345_v59 }
 0x10c   :  { %270 = vst.msk [vmem:[#allocation2] sm:$0xff] %vm200_vm1, %v268_v61  ;;  %1346 = vtanh.f32 %v265_v60 }
 0x10d   :  { %276 = vst.msk [vmem:[#allocation2 + $0x70] sm:$0xff] %vm200_vm1, %v274_v62 }
 0x112   :  { %v1347_v63 = vpop.eup %1346 }
 0x113   :  { %v269_v0 = vsel %vm72_vm2, %v1347_v63, %v218_v55  ;;  %v275_v1 = vsel %vm72_vm2, %v220_v56, %v1347_v63  ;;  %v284_v2 = vpack.c.bf16 %v1347_v63, %v1345_v59 }
 0x114   :  { %271 = vst.msk [vmem:[#allocation2 + $0x8] sm:$0xff] %vm200_vm1, %v269_v0 }
 0x115   :  { %277 = vst.msk [vmem:[#allocation2 + $0x78] sm:$0xff] %vm200_vm1, %v275_v1  ;;  %1228 = vmatmul.msk.bf16.vlgmr.msra.gmra.mxu2 %vm200_vm1, %v284_v2 }
 0x116   :  { %520 = vmatpush.bf16.msra.mxu2 %v1458_v7 }
 0x11a   :  { %521 = vmatpush.bf16.msra.mxu2 %v1464_v8 }
 0x11e   :  { %522 = vmatpush.bf16.msra.mxu2 %v1472_v9 }
 0x122   :  { %523 = vmatpush.bf16.msra.mxu2 %v1485_v11 }
 0x198   :  { %v297_v6 = vpop.f32.mrf.mxu2 }
 0x199   :  { %v302_v10 = vadd.f32 %v297_v6, %v282_v5 }
 0x19b   :  { %1348 = vtanh.f32 %v302_v10 }
 0x1a0   :  { %v299_v7 = vpop.f32.mrf.mxu2 }
 0x1a1   :  { %v1349_v16 = vpop.eup %1348  ;;  %v303_v8 = vadd.f32 %v299_v7, %v283_v15 }
 0x1a2   :  { %v306_v9 = vsel %vm72_vm2, %v1349_v16, %v278_v4  ;;  %v312_v11 = vsel %vm72_vm2, %v280_v3, %v1349_v16 }
 0x1a3   :  { %308 = vst.msk [vmem:[#allocation2 + $0x10] sm:$0xff] %vm200_vm1, %v306_v9  ;;  %1350 = vtanh.f32 %v303_v8 }
 0x1a4   :  { %314 = vst.msk [vmem:[#allocation2 + $0x60] sm:$0xff] %vm200_vm1, %v312_v11 }
 0x1a9   :  { %v1351_v17 = vpop.eup %1350 }
 0x1aa   :  { %v307_v18 = vsel %vm72_vm2, %v1351_v17, %v279_v14  ;;  %v313_v19 = vsel %vm72_vm2, %v281_v13, %v1351_v17  ;;  %v322_v20 = vpack.c.bf16 %v1351_v17, %v1349_v16 }
 0x1ab   :  { %309 = vst.msk [vmem:[#allocation2 + $0x18] sm:$0xff] %vm200_vm1, %v307_v18 }
 0x1ac   :  { %315 = vst.msk [vmem:[#allocation2 + $0x68] sm:$0xff] %vm200_vm1, %v313_v19  ;;  %1229 = vmatmul.msk.bf16.vlgmr.msra.gmra.mxu3 %vm200_vm1, %v322_v20 }
 0x22f   :  { %v335_v24 = vpop.f32.mrf.mxu3 }
 0x230   :  { %v340_v25 = vadd.f32 %v335_v24, %v320_v23 }
 0x232   :  { %1352 = vtanh.f32 %v340_v25 }
 0x237   :  { %v337_v29 = vpop.f32.mrf.mxu3 }
 0x238   :  { %v1353_v30 = vpop.eup %1352  ;;  %v341_v31 = vadd.f32 %v337_v29, %v321_v28  ;;  %v470_v28 = vld [vmem:[#allocation2 + $0x10] sm:$0xff] }
 0x239   :  { %v344_v32 = vsel %vm72_vm2, %v1353_v30, %v316_v22  ;;  %v350_v33 = vsel %vm72_vm2, %v318_v21, %v1353_v30 }
 0x23a   :  { %346 = vst.msk [vmem:[#allocation2 + $0x20] sm:$0xff] %vm200_vm1, %v344_v32  ;;  %1354 = vtanh.f32 %v341_v31  ;;  %v469_v32 = vld [vmem:[#allocation2 + $0x68] sm:$0xff] }
 0x23b   :  { %352 = vst.msk [vmem:[#allocation2 + $0x50] sm:$0xff] %vm200_vm1, %v350_v33  ;;  %v471_v33 = vld [vmem:[#allocation2 + $0x18] sm:$0xff] }
 0x240   :  { %v1355_v34 = vpop.eup %1354 }
 0x241   :  { %v345_v35 = vsel %vm72_vm2, %v1355_v34, %v317_v27  ;;  %v351_v36 = vsel %vm72_vm2, %v319_v26, %v1355_v34  ;;  %v360_v37 = vpack.c.bf16 %v1355_v34, %v1353_v30  ;;  %v432_v15 = vld [vmem:[#allocation2 + $0x20] sm:$0xff]  ;;  %v473_v34 = vsel %vm72_vm2, %v469_v32, %v471_v33 }
 0x242   :  { %347 = vst.msk [vmem:[#allocation2 + $0x28] sm:$0xff] %vm200_vm1, %v345_v35  ;;  %v430_v14 = vld [vmem:[#allocation2 + $0x50] sm:$0xff]  ;;  %v468_v27 = vld [vmem:[#allocation2 + $0x60] sm:$0xff] }
 0x243   :  { %353 = vst.msk [vmem:[#allocation2 + $0x58] sm:$0xff] %vm200_vm1, %v351_v36  ;;  %1230 = vmatmul.msk.bf16.vlgmr.msrb.gmra.mxu1 %vm200_vm1, %v360_v37  ;;  %v434_v7 = vsel %vm72_vm2, %v430_v14, %v432_v15  ;;  %v472_v29 = vsel %vm72_vm2, %v468_v27, %v470_v28 }
 0x249   :  { %v433_v11 = vld [vmem:[#allocation2 + $0x28] sm:$0xff] }
 0x24a   :  { %v431_v9 = vld [vmem:[#allocation2 + $0x58] sm:$0xff] }
 0x24b   :  { %v435_v17 = vsel %vm72_vm2, %v431_v9, %v433_v11 }
 0x2c0   :  { %v373_v41 = vpop.f32.mrf.mxu1 }
 0x2c1   :  { %v378_v42 = vadd.f32 %v373_v41, %v358_v40 }
 0x2c3   :  { %1356 = vtanh.f32 %v378_v42 }
 0x2c8   :  { %v375_v46 = vpop.f32.mrf.mxu1 }
 0x2c9   :  { %v1357_v48 = vpop.eup %1356  ;;  %v379_v49 = vadd.f32 %v375_v46, %v359_v45  ;;  %v1322_v45 = vld [vmem:[%s1951_s1 + $0x40] sm:$0xff]  ;;  %v1321_v46 = vld [vmem:[%s1951_s1 + $0x38] sm:$0xff] }
 0x2ca   :  { %v382_v50 = vsel %vm72_vm2, %v1357_v48, %v354_v39  ;;  %v388_v51 = vsel %vm72_vm2, %v356_v38, %v1357_v48 }
 0x2cb   :  { %384 = vst.msk [vmem:[#allocation2 + $0x30] sm:$0xff] %vm200_vm1, %v382_v50  ;;  %1358 = vtanh.f32 %v379_v49  ;;  %v506_v49 = vld [vmem:[#allocation2 + $0x70] sm:$0xff]  ;;  %v508_v50 = vld [vmem:[#allocation2] sm:$0xff] }
 0x2cc   :  { %390 = vst.msk [vmem:[#allocation2 + $0x40] sm:$0xff] %vm200_vm1, %v388_v51  ;;  %v510_v51 = vsel %vm72_vm2, %v506_v49, %v508_v50 }
 0x2d1   :  { %v1359_v52 = vpop.eup %1358 }
 0x2d2   :  { %v383_v53 = vsel %vm72_vm2, %v1359_v52, %v355_v44  ;;  %v389_v54 = vsel %vm72_vm2, %v357_v43, %v1359_v52  ;;  %v398_v55 = vpack.c.bf16 %v1359_v52, %v1357_v48  ;;  %v394_v57 = vld [vmem:[#allocation2 + $0x30] sm:$0xff]  ;;  %v1323_v44 = vld [vmem:[%s1951_s1 + $0x48] sm:$0xff] }
 0x2d3   :  { %385 = vst.msk [vmem:[#allocation2 + $0x38] sm:$0xff] %vm200_vm1, %v383_v53  ;;  %v392_v56 = vld [vmem:[#allocation2 + $0x40] sm:$0xff]  ;;  %621 = vmatpush.bf16.msra.mxu3 %v1323_v44  ;;  %v1320_v48 = vld [vmem:[%s1951_s1 + $0x30] sm:$0xff] }
 0x2d4   :  { %391 = vst.msk [vmem:[#allocation2 + $0x48] sm:$0xff] %vm200_vm1, %v389_v54  ;;  %1231 = vmatmul.msk.bf16.vlgmr.msrb.gmra.mxu2 %vm200_vm1, %v398_v55  ;;  %v396_v58 = vsel %vm72_vm2, %v392_v56, %v394_v57  ;;  %v507_v54 = vld [vmem:[#allocation2 + $0x78] sm:$0xff]  ;;  %v509_v55 = vld [vmem:[#allocation2 + $0x8] sm:$0xff] }
 0x2d7   :  { %622 = vmatpush.bf16.msra.mxu3 %v1322_v45 }
 0x2da   :  { %v395_v62 = vld [vmem:[#allocation2 + $0x38] sm:$0xff] }
 0x2db   :  { %v393_v61 = vld [vmem:[#allocation2 + $0x48] sm:$0xff]  ;;  %623 = vmatpush.bf16.msra.mxu3 %v1321_v46 }
 0x2dc   :  { %v397_v63 = vsel %vm72_vm2, %v393_v61, %v395_v62 }
 0x2df   :  { %624 = vmatpush.bf16.msra.mxu3 %v1320_v48 }
 0x357   :  { %v411_v59 = vpop.f32.mrf.mxu2 }
 0x358   :  { %v416_v60 = vadd.f32 %v411_v59, %v396_v58 }
 0x35a   :  { %1360 = vtanh.f32 %v416_v60 }
 0x35f   :  { %v413_v0 = vpop.f32.mrf.mxu2 }
 0x360   :  { %v1361_v1 = vpop.eup %1360  ;;  %v417_v2 = vadd.f32 %v413_v0, %v397_v63 }
 0x361   :  { %v420_v3 = vsel %vm72_vm2, %v1361_v1, %v392_v56  ;;  %v426_v4 = vsel %vm72_vm2, %v394_v57, %v1361_v1  ;;  %v511_v56 = vsel %vm72_vm2, %v507_v54, %v509_v55 }
 0x362   :  { %422 = vst.msk [vmem:[#allocation2 + $0x40] sm:$0xff] %vm200_vm1, %v420_v3  ;;  %1362 = vtanh.f32 %v417_v2 }
 0x363   :  { %428 = vst.msk [vmem:[#allocation2 + $0x30] sm:$0xff] %vm200_vm1, %v426_v4 }
 0x368   :  { %v1363_v5 = vpop.eup %1362 }
 0x369   :  { %v421_v6 = vsel %vm72_vm2, %v1363_v5, %v393_v61  ;;  %v427_v10 = vsel %vm72_vm2, %v395_v62, %v1363_v5  ;;  %v436_v13 = vpack.c.bf16 %v1363_v5, %v1361_v1 }
 0x36a   :  { %423 = vst.msk [vmem:[#allocation2 + $0x48] sm:$0xff] %vm200_vm1, %v421_v6 }
 0x36b   :  { %429 = vst.msk [vmem:[#allocation2 + $0x38] sm:$0xff] %vm200_vm1, %v427_v10  ;;  %1232 = vmatmul.msk.bf16.vlgmr.msrb.gmra.mxu3 %vm200_vm1, %v436_v13 }
 0x3ee   :  { %v449_v16 = vpop.f32.mrf.mxu3 }
 0x3ef   :  { %v454_v8 = vadd.f32 %v449_v16, %v434_v7  ;;  %v550_v7 = vld [vmem:[#allocation2 + $0x30] sm:$0xff] }
 0x3f1   :  { %1364 = vtanh.f32 %v454_v8  ;;  %v553_v8 = vld [vmem:[#allocation2 + $0x48] sm:$0xff] }
 0x3f6   :  { %v451_v18 = vpop.f32.mrf.mxu3 }
 0x3f7   :  { %v1365_v19 = vpop.eup %1364  ;;  %v455_v20 = vadd.f32 %v451_v18, %v435_v17  ;;  %v1697_v17 = vld [vmem:[%s1951_s1 + $0x68] sm:$0xff]  ;;  %v1703_v18 = vld [vmem:[%s1951_s1 + $0x60] sm:$0xff] }
 0x3f8   :  { %v458_v21 = vsel %vm72_vm2, %v1365_v19, %v430_v14  ;;  %v464_v22 = vsel %vm72_vm2, %v432_v15, %v1365_v19  ;;  %v551_v15 = vld [vmem:[#allocation2 + $0x38] sm:$0xff]  ;;  %716 = vmatpush.bf16.msrb.mxu1 %v1697_v17  ;;  %754 = vmatpush.bf16.msrb.mxu2 %v1697_v17 }
 0x3f9   :  { %460 = vst.msk [vmem:[#allocation2 + $0x50] sm:$0xff] %vm200_vm1, %v458_v21  ;;  %1366 = vtanh.f32 %v455_v20  ;;  %v563_v16 = vpack.c.bf16 %v551_v15, %v550_v7 }
 0x3fa   :  { %466 = vst.msk [vmem:[#allocation2 + $0x20] sm:$0xff] %vm200_vm1, %v464_v22  ;;  %v1712_v22 = vld [vmem:[%s1951_s1 + $0x58] sm:$0xff] }
 0x3fc   :  { %717 = vmatpush.bf16.msrb.mxu1 %v1703_v18  ;;  %755 = vmatpush.bf16.msrb.mxu2 %v1703_v18 }
 0x3ff   :  { %v1367_v23 = vpop.eup %1366 }
 0x400   :  { %v459_v24 = vsel %vm72_vm2, %v1367_v23, %v431_v9  ;;  %v465_v25 = vsel %vm72_vm2, %v433_v11, %v1367_v23  ;;  %v474_v26 = vpack.c.bf16 %v1367_v23, %v1365_v19  ;;  %v552_v9 = vld [vmem:[#allocation2 + $0x40] sm:$0xff]  ;;  %v554_v20 = vld [vmem:[#allocation2 + $0x50] sm:$0xff]  ;;  %718 = vmatpush.bf16.msrb.mxu1 %v1712_v22  ;;  %756 = vmatpush.bf16.msrb.mxu2 %v1712_v22 }
 0x401   :  { %461 = vst.msk [vmem:[#allocation2 + $0x58] sm:$0xff] %vm200_vm1, %v459_v24  ;;  %v548_v13 = vld [vmem:[#allocation2 + $0x20] sm:$0xff]  ;;  %v564_v11 = vpack.c.bf16 %v553_v8, %v552_v9  ;;  %v1718_v23 = vld [vmem:[%s1951_s1 + $0x50] sm:$0xff] }
 0x402   :  { %467 = vst.msk [vmem:[#allocation2 + $0x28] sm:$0xff] %vm200_vm1, %v465_v25  ;;  %1233 = vmatmul.msk.bf16.vlgmr.msra.gmra.mxu1 %vm200_vm1, %v474_v26 }
 0x404   :  { %719 = vmatpush.bf16.msrb.mxu1 %v1718_v23  ;;  %757 = vmatpush.bf16.msrb.mxu2 %v1718_v23 }
 0x408   :  { %v555_v19 = vld [vmem:[#allocation2 + $0x58] sm:$0xff]  ;;  %792 = vmatpush.bf16.msra.mxu1 %v1697_v17 }
 0x409   :  { %v549_v10 = vld [vmem:[#allocation2 + $0x28] sm:$0xff]  ;;  %v565_v21 = vpack.c.bf16 %v555_v19, %v554_v20 }
 0x40a   :  { %v562_v14 = vpack.c.bf16 %v549_v10, %v548_v13 }
 0x40c   :  { %793 = vmatpush.bf16.msra.mxu1 %v1703_v18 }
 0x410   :  { %794 = vmatpush.bf16.msra.mxu1 %v1712_v22 }
 0x412   :  { %720 = vmatmul.bf16.vlgmr.msrb.gmra.mxu1 %v1408_v12 }
 0x414   :  { %795 = vmatpush.bf16.msra.mxu1 %v1718_v23 }
 0x418   :  { %868 = vmatpush.bf16.msrb.mxu1 %v1697_v17 }
 0x41c   :  { %869 = vmatpush.bf16.msrb.mxu1 %v1703_v18 }
 0x420   :  { %870 = vmatpush.bf16.msrb.mxu1 %v1712_v22 }
 0x424   :  { %871 = vmatpush.bf16.msrb.mxu1 %v1718_v23 }
 0x47f   :  { %v487_v30 = vpop.f32.mrf.mxu1 }
 0x480   :  { %v492_v31 = vadd.f32 %v487_v30, %v472_v29  ;;  %v1342_v29 = vld [vmem:[%s1952_s2 + $0x1] ss:$0 sm:$0xff] }
 0x482   :  { %1368 = vtanh.f32 %v492_v31 }
 0x487   :  { %v489_v35 = vpop.f32.mrf.mxu1 }
 0x488   :  { %v1369_v36 = vpop.eup %1368  ;;  %v493_v37 = vadd.f32 %v489_v35, %v473_v34 }
 0x489   :  { %v496_v38 = vsel %vm72_vm2, %v1369_v36, %v468_v27  ;;  %v502_v39 = vsel %vm72_vm2, %v470_v28, %v1369_v36 }
 0x48a   :  { %498 = vst.msk [vmem:[#allocation2 + $0x60] sm:$0xff] %vm200_vm1, %v496_v38  ;;  %1370 = vtanh.f32 %v493_v37 }
 0x48b   :  { %504 = vst.msk [vmem:[#allocation2 + $0x10] sm:$0xff] %vm200_vm1, %v502_v39 }
 0x490   :  { %v1371_v40 = vpop.eup %1370 }
 0x491   :  { %v497_v41 = vsel %vm72_vm2, %v1371_v40, %v469_v32  ;;  %v503_v42 = vsel %vm72_vm2, %v471_v33, %v1371_v40  ;;  %v512_v43 = vpack.c.bf16 %v1371_v40, %v1369_v36  ;;  %v556_v25 = vld [vmem:[#allocation2 + $0x60] sm:$0xff] }
 0x492   :  { %499 = vst.msk [vmem:[#allocation2 + $0x68] sm:$0xff] %vm200_vm1, %v497_v41  ;;  %v546_v5 = vld [vmem:[#allocation2 + $0x10] sm:$0xff] }
 0x493   :  { %505 = vst.msk [vmem:[#allocation2 + $0x18] sm:$0xff] %vm200_vm1, %v503_v42  ;;  %1234 = vmatmul.msk.bf16.vlgmr.msra.gmra.mxu2 %vm200_vm1, %v512_v43 }
 0x494   :  { %830 = vmatpush.bf16.msra.mxu2 %v1697_v17 }
 0x498   :  { %831 = vmatpush.bf16.msra.mxu2 %v1703_v18 }
 0x499   :  { %v557_v24 = vld [vmem:[#allocation2 + $0x68] sm:$0xff] }
 0x49a   :  { %v547_v4 = vld [vmem:[#allocation2 + $0x18] sm:$0xff]  ;;  %v566_v26 = vpack.c.bf16 %v557_v24, %v556_v25 }
 0x49b   :  { %v561_v6 = vpack.c.bf16 %v547_v4, %v546_v5 }
 0x49c   :  { %832 = vmatpush.bf16.msra.mxu2 %v1712_v22 }
 0x4a0   :  { %833 = vmatpush.bf16.msra.mxu2 %v1718_v23 }
 0x516   :  { %v525_v52 = vpop.f32.mrf.mxu2 }
 0x517   :  { %v530_v53 = vadd.f32 %v525_v52, %v510_v51 }
 0x519   :  { %1372 = vtanh.f32 %v530_v53 }
 0x51e   :  { %v527_v57 = vpop.f32.mrf.mxu2 }
 0x51f   :  { %v1373_v58 = vpop.eup %1372  ;;  %v531_v59 = vadd.f32 %v527_v57, %v511_v56 }
 0x520   :  { %v534_v60 = vsel %vm72_vm2, %v1373_v58, %v506_v49  ;;  %v540_v61 = vsel %vm72_vm2, %v508_v50, %v1373_v58 }
 0x521   :  { %536 = vst.msk [vmem:[#allocation2 + $0x70] sm:$0xff] %vm200_vm1, %v534_v60  ;;  %1374 = vtanh.f32 %v531_v59 }
 0x522   :  { %542 = vst.msk [vmem:[#allocation2] sm:$0xff] %vm200_vm1, %v540_v61 }
 0x527   :  { %v1375_v62 = vpop.eup %1374 }
 0x528   :  { %v535_v63 = vsel %vm72_vm2, %v1375_v62, %v507_v54  ;;  %v541_v0 = vsel %vm72_vm2, %v509_v55, %v1375_v62  ;;  %v558_v27 = vld [vmem:[#allocation2 + $0x70] sm:$0xff]  ;;  %v721_v62 = vpop.f32.mrf.mxu1 }
 0x529   :  { %537 = vst.msk [vmem:[#allocation2 + $0x78] sm:$0xff] %vm200_vm1, %v535_v63  ;;  %v544_v1 = vld [vmem:[#allocation2] sm:$0xff] }
 0x52a   :  { %543 = vst.msk [vmem:[#allocation2 + $0x8] sm:$0xff] %vm200_vm1, %v541_v0 }
 0x530   :  { %v559_v12 = vld [vmem:[#allocation2 + $0x78] sm:$0xff]  ;;  %v723_v10 = vpop.f32.mrf.mxu1 }
 0x531   :  { %v545_v2 = vld [vmem:[#allocation2 + $0x8] sm:$0xff]  ;;  %v567_v28 = vpack.c.bf16 %v559_v12, %v558_v27 }
 0x532   :  { %v560_v3 = vpack.c.bf16 %v545_v2, %v544_v1 }
 0x534   :  { %1251 = vmatmul.msk.bf16.vlgmr.msra.gmra.mxu3 %vm200_vm1, %v560_v3 }
 0x544   :  { %1252 = vmatmul.msk.bf16.gmra.mxu3 %vm200_vm1, %v561_v6 }
 0x554   :  { %1253 = vmatmul.msk.bf16.gmra.mxu3 %vm200_vm1, %v562_v14 }
 0x564   :  { %1254 = vmatmul.msk.bf16.gmra.mxu3 %vm200_vm1, %v563_v16 }
 0x574   :  { %1255 = vmatmul.msk.bf16.gmra.mxu3 %vm200_vm1, %v564_v11 }
 0x584   :  { %1256 = vmatmul.msk.bf16.gmra.mxu3 %vm200_vm1, %v565_v21 }
 0x594   :  { %1257 = vmatmul.msk.bf16.gmra.mxu3 %vm200_vm1, %v566_v26 }
 0x5a4   :  { %1258 = vmatmul.msk.bf16.gmra.mxu3 %vm200_vm1, %v567_v28 }
 0x5b7   :  { %v626_v30 = vpop.f32.mrf.mxu3 }
 0x5b8   :  { %v627_v31 = vadd.f32 %v1342_v29, %v626_v30 }
 0x5ba   :  { %666 = vst.msk [vmem:[#allocation3] sm:$0xff] %vm200_vm1, %v627_v31 }
 0x5bf   :  { %v628_v32 = vpop.f32.mrf.mxu3 }
 0x5c0   :  { %v629_v33 = vadd.f32 %v1342_v29, %v628_v32 }
 0x5c1   :  { %v682_v0 = vld [vmem:[#allocation3] sm:$0xff] }
 0x5c2   :  { %667 = vst.msk [vmem:[#allocation3 + $0x8] sm:$0xff] %vm200_vm1, %v629_v33 }
 0x5c7   :  { %v631_v34 = vpop.f32.mrf.mxu3 }
 0x5c8   :  { %v632_v35 = vadd.f32 %v1342_v29, %v631_v34 }
 0x5c9   :  { %v683_v4 = vld [vmem:[#allocation3 + $0x8] sm:$0xff] }
 0x5ca   :  { %668 = vst.msk [vmem:[#allocation3 + $0x10] sm:$0xff] %vm200_vm1, %v632_v35 }
 0x5cf   :  { %v633_v36 = vpop.f32.mrf.mxu3 }
 0x5d0   :  { %v634_v37 = vadd.f32 %v1342_v29, %v633_v36 }
 0x5d1   :  { %v740_v20 = vld [vmem:[#allocation3 + $0x10] sm:$0xff] }
 0x5d2   :  { %669 = vst.msk [vmem:[#allocation3 + $0x18] sm:$0xff] %vm200_vm1, %v634_v37 }
 0x5d7   :  { %v636_v38 = vpop.f32.mrf.mxu3 }
 0x5d8   :  { %v637_v39 = vadd.f32 %v1342_v29, %v636_v38 }
 0x5d9   :  { %v741_v12 = vld [vmem:[#allocation3 + $0x18] sm:$0xff] }
 0x5da   :  { %670 = vst.msk [vmem:[#allocation3 + $0x20] sm:$0xff] %vm200_vm1, %v637_v39 }
 0x5df   :  { %v638_v40 = vpop.f32.mrf.mxu3 }
 0x5e0   :  { %v639_v41 = vadd.f32 %v1342_v29, %v638_v40 }
 0x5e1   :  { %v778_v38 = vld [vmem:[#allocation3 + $0x20] sm:$0xff] }
 0x5e2   :  { %671 = vst.msk [vmem:[#allocation3 + $0x28] sm:$0xff] %vm200_vm1, %v639_v41 }
 0x5e7   :  { %v641_v42 = vpop.f32.mrf.mxu3 }
 0x5e8   :  { %v642_v43 = vadd.f32 %v1342_v29, %v641_v42 }
 0x5ea   :  { %672 = vst.msk [vmem:[#allocation3 + $0x30] sm:$0xff] %vm200_vm1, %v642_v43  ;;  %v779_v43 = vld [vmem:[#allocation3 + $0x28] sm:$0xff] }
 0x5ef   :  { %v643_v44 = vpop.f32.mrf.mxu3 }
 0x5f0   :  { %v644_v45 = vadd.f32 %v1342_v29, %v643_v44 }
 0x5f2   :  { %673 = vst.msk [vmem:[#allocation3 + $0x38] sm:$0xff] %vm200_vm1, %v644_v45 }
 0x5f7   :  { %v646_v46 = vpop.f32.mrf.mxu3 }
 0x5f8   :  { %v647_v48 = vadd.f32 %v1342_v29, %v646_v46 }
 0x5fa   :  { %674 = vst.msk [vmem:[#allocation3 + $0x40] sm:$0xff] %vm200_vm1, %v647_v48 }
 0x5ff   :  { %v648_v49 = vpop.f32.mrf.mxu3 }
 0x600   :  { %v649_v50 = vadd.f32 %v1342_v29, %v648_v49 }
 0x602   :  { %675 = vst.msk [vmem:[#allocation3 + $0x48] sm:$0xff] %vm200_vm1, %v649_v50 }
 0x607   :  { %v651_v51 = vpop.f32.mrf.mxu3 }
 0x608   :  { %v652_v52 = vadd.f32 %v1342_v29, %v651_v51 }
 0x60a   :  { %676 = vst.msk [vmem:[#allocation3 + $0x50] sm:$0xff] %vm200_vm1, %v652_v52 }
 0x60f   :  { %v653_v53 = vpop.f32.mrf.mxu3 }
 0x610   :  { %v654_v54 = vadd.f32 %v1342_v29, %v653_v53 }
 0x611   :  { %v780_v37 = vld [vmem:[#allocation3 + $0x50] sm:$0xff] }
 0x612   :  { %677 = vst.msk [vmem:[#allocation3 + $0x58] sm:$0xff] %vm200_vm1, %v654_v54  ;;  %v782_v39 = vsel %vm72_vm2, %v778_v38, %v780_v37 }
 0x617   :  { %v656_v55 = vpop.f32.mrf.mxu3 }
 0x618   :  { %v657_v56 = vadd.f32 %v1342_v29, %v656_v55  ;;  %v818_v55 = vld [vmem:[#allocation3 + $0x40] sm:$0xff] }
 0x619   :  { %v781_v42 = vld [vmem:[#allocation3 + $0x58] sm:$0xff] }
 0x61a   :  { %678 = vst.msk [vmem:[#allocation3 + $0x60] sm:$0xff] %vm200_vm1, %v657_v56  ;;  %v783_v44 = vsel %vm72_vm2, %v779_v43, %v781_v42  ;;  %v816_v56 = vld [vmem:[#allocation3 + $0x30] sm:$0xff] }
 0x61f   :  { %v658_v57 = vpop.f32.mrf.mxu3 }
 0x620   :  { %v659_v58 = vadd.f32 %v1342_v29, %v658_v57  ;;  %v820_v57 = vsel %vm72_vm2, %v816_v56, %v818_v55 }
 0x621   :  { %v742_v19 = vld [vmem:[#allocation3 + $0x60] sm:$0xff] }
 0x622   :  { %679 = vst.msk [vmem:[#allocation3 + $0x68] sm:$0xff] %vm200_vm1, %v659_v58  ;;  %v744_v21 = vsel %vm72_vm2, %v740_v20, %v742_v19 }
 0x627   :  { %v661_v59 = vpop.f32.mrf.mxu3 }
 0x628   :  { %v662_v60 = vadd.f32 %v1342_v29, %v661_v59 }
 0x629   :  { %v743_v26 = vld [vmem:[#allocation3 + $0x68] sm:$0xff] }
 0x62a   :  { %680 = vst.msk [vmem:[#allocation3 + $0x70] sm:$0xff] %vm200_vm1, %v662_v60  ;;  %v745_v27 = vsel %vm72_vm2, %v741_v12, %v743_v26  ;;  %v819_v60 = vld [vmem:[#allocation3 + $0x48] sm:$0xff] }
 0x62f   :  { %v663_v61 = vpop.f32.mrf.mxu3 }
 0x630   :  { %v664_v63 = vadd.f32 %v1342_v29, %v663_v61  ;;  %v817_v61 = vld [vmem:[#allocation3 + $0x38] sm:$0xff] }
 0x631   :  { %v684_v1 = vld [vmem:[#allocation3 + $0x70] sm:$0xff] }
 0x632   :  { %v686_v2 = vsel %vm72_vm2, %v682_v0, %v684_v1  ;;  %681 = vst.msk [vmem:[#allocation3 + $0x78] sm:$0xff] %vm200_vm1, %v664_v63 }
 0x633   :  { %v726_v3 = vadd.f32 %v721_v62, %v686_v2  ;;  %v821_v62 = vsel %vm72_vm2, %v817_v61, %v819_v60 }
 0x635   :  { %1376 = vtanh.f32 %v726_v3 }
 0x639   :  { %v685_v5 = vld [vmem:[#allocation3 + $0x78] sm:$0xff] }
 0x63a   :  { %v687_v6 = vsel %vm72_vm2, %v683_v4, %v685_v5 }
 0x63b   :  { %v1377_v13 = vpop.eup %1376  ;;  %v727_v14 = vadd.f32 %v723_v10, %v687_v6 }
 0x63c   :  { %v730_v15 = vsel %vm72_vm2, %v1377_v13, %v682_v0  ;;  %v736_v7 = vsel %vm72_vm2, %v684_v1, %v1377_v13 }
 0x63d   :  { %732 = vst.msk [vmem:[#allocation3] sm:$0xff] %vm200_vm1, %v730_v15  ;;  %1378 = vtanh.f32 %v727_v14 }
 0x63e   :  { %738 = vst.msk [vmem:[#allocation3 + $0x70] sm:$0xff] %vm200_vm1, %v736_v7 }
 0x643   :  { %v1379_v16 = vpop.eup %1378 }
 0x644   :  { %v731_v8 = vsel %vm72_vm2, %v1379_v16, %v683_v4  ;;  %v737_v9 = vsel %vm72_vm2, %v685_v5, %v1379_v16  ;;  %v746_v11 = vpack.c.bf16 %v1379_v16, %v1377_v13 }
 0x645   :  { %733 = vst.msk [vmem:[#allocation3 + $0x8] sm:$0xff] %vm200_vm1, %v731_v8 }
 0x646   :  { %739 = vst.msk [vmem:[#allocation3 + $0x78] sm:$0xff] %vm200_vm1, %v737_v9  ;;  %1275 = vmatmul.msk.bf16.vlgmr.msrb.gmra.mxu2 %vm200_vm1, %v746_v11 }
 0x647   :  { %906 = vmatpush.bf16.msrb.mxu2 %v1697_v17 }
 0x64b   :  { %907 = vmatpush.bf16.msrb.mxu2 %v1703_v18 }
 0x64f   :  { %908 = vmatpush.bf16.msrb.mxu2 %v1712_v22 }
 0x653   :  { %909 = vmatpush.bf16.msrb.mxu2 %v1718_v23 }
 0x6c9   :  { %v759_v24 = vpop.f32.mrf.mxu2 }
 0x6ca   :  { %v764_v25 = vadd.f32 %v759_v24, %v744_v21 }
 0x6cc   :  { %1380 = vtanh.f32 %v764_v25 }
 0x6d1   :  { %v761_v28 = vpop.f32.mrf.mxu2 }
 0x6d2   :  { %v1381_v29 = vpop.eup %1380  ;;  %v765_v30 = vadd.f32 %v761_v28, %v745_v27  ;;  %v1329_v27 = vld [vmem:[%s1951_s1 + $0x78] sm:$0xff] }
 0x6d3   :  { %v768_v31 = vsel %vm72_vm2, %v1381_v29, %v740_v20  ;;  %v774_v32 = vsel %vm72_vm2, %v742_v19, %v1381_v29 }
 0x6d4   :  { %770 = vst.msk [vmem:[#allocation3 + $0x10] sm:$0xff] %vm200_vm1, %v768_v31  ;;  %1382 = vtanh.f32 %v765_v30  ;;  %v1328_v30 = vld [vmem:[%s1951_s1 + $0x70] sm:$0xff] }
 0x6d5   :  { %776 = vst.msk [vmem:[#allocation3 + $0x60] sm:$0xff] %vm200_vm1, %v774_v32 }
 0x6da   :  { %v1383_v33 = vpop.eup %1382 }
 0x6db   :  { %v769_v34 = vsel %vm72_vm2, %v1383_v33, %v741_v12  ;;  %v775_v35 = vsel %vm72_vm2, %v743_v26, %v1383_v33  ;;  %v784_v36 = vpack.c.bf16 %v1383_v33, %v1381_v29  ;;  %v1331_v26 = vld [vmem:[%s1951_s1 + $0x88] sm:$0xff]  ;;  %v1330_v12 = vld [vmem:[%s1951_s1 + $0x80] sm:$0xff] }
 0x6dc   :  { %771 = vst.msk [vmem:[#allocation3 + $0x18] sm:$0xff] %vm200_vm1, %v769_v34  ;;  %1083 = vmatpush.bf16.msrb.mxu0 %v1331_v26 }
 0x6dd   :  { %777 = vst.msk [vmem:[#allocation3 + $0x68] sm:$0xff] %vm200_vm1, %v775_v35  ;;  %1276 = vmatmul.msk.bf16.vlgmr.msra.gmra.mxu1 %vm200_vm1, %v784_v36 }
 0x6de   :  { %944 = vmatpush.bf16.msra.mxu1 %v1697_v17 }
 0x6e0   :  { %1084 = vmatpush.bf16.msrb.mxu0 %v1330_v12 }
 0x6e2   :  { %945 = vmatpush.bf16.msra.mxu1 %v1703_v18 }
 0x6e4   :  { %1085 = vmatpush.bf16.msrb.mxu0 %v1329_v27 }
 0x6e6   :  { %946 = vmatpush.bf16.msra.mxu1 %v1712_v22 }
 0x6e8   :  { %1086 = vmatpush.bf16.msrb.mxu0 %v1328_v30 }
 0x6ea   :  { %947 = vmatpush.bf16.msra.mxu1 %v1718_v23 }
 0x75a   :  { %v797_v40 = vpop.f32.mrf.mxu1 }
 0x75b   :  { %v802_v41 = vadd.f32 %v797_v40, %v782_v39 }
 0x75d   :  { %1384 = vtanh.f32 %v802_v41 }
 0x762   :  { %v799_v45 = vpop.f32.mrf.mxu1 }
 0x763   :  { %v1385_v46 = vpop.eup %1384  ;;  %v803_v48 = vadd.f32 %v799_v45, %v783_v44 }
 0x764   :  { %v806_v49 = vsel %vm72_vm2, %v1385_v46, %v778_v38  ;;  %v812_v50 = vsel %vm72_vm2, %v780_v37, %v1385_v46 }
 0x765   :  { %808 = vst.msk [vmem:[#allocation3 + $0x20] sm:$0xff] %vm200_vm1, %v806_v49  ;;  %1386 = vtanh.f32 %v803_v48 }
 0x766   :  { %814 = vst.msk [vmem:[#allocation3 + $0x50] sm:$0xff] %vm200_vm1, %v812_v50 }
 0x76b   :  { %v1387_v51 = vpop.eup %1386 }
 0x76c   :  { %v807_v52 = vsel %vm72_vm2, %v1387_v51, %v779_v43  ;;  %v813_v53 = vsel %vm72_vm2, %v781_v42, %v1387_v51  ;;  %v822_v54 = vpack.c.bf16 %v1387_v51, %v1385_v46  ;;  %v894_v29 = vld [vmem:[#allocation3 + $0x20] sm:$0xff] }
 0x76d   :  { %809 = vst.msk [vmem:[#allocation3 + $0x28] sm:$0xff] %vm200_vm1, %v807_v52  ;;  %v892_v28 = vld [vmem:[#allocation3 + $0x50] sm:$0xff] }
 0x76e   :  { %815 = vst.msk [vmem:[#allocation3 + $0x58] sm:$0xff] %vm200_vm1, %v813_v53  ;;  %1277 = vmatmul.msk.bf16.vlgmr.msra.gmra.mxu2 %vm200_vm1, %v822_v54  ;;  %v896_v31 = vsel %vm72_vm2, %v892_v28, %v894_v29 }
 0x76f   :  { %982 = vmatpush.bf16.msra.mxu2 %v1697_v17 }
 0x773   :  { %983 = vmatpush.bf16.msra.mxu2 %v1703_v18 }
 0x774   :  { %v895_v35 = vld [vmem:[#allocation3 + $0x28] sm:$0xff] }
 0x775   :  { %v893_v34 = vld [vmem:[#allocation3 + $0x58] sm:$0xff] }
 0x776   :  { %v897_v36 = vsel %vm72_vm2, %v893_v34, %v895_v35 }
 0x777   :  { %984 = vmatpush.bf16.msra.mxu2 %v1712_v22 }
 0x77b   :  { %985 = vmatpush.bf16.msra.mxu2 %v1718_v23 }
 0x7f1   :  { %v835_v58 = vpop.f32.mrf.mxu2 }
 0x7f2   :  { %v840_v59 = vadd.f32 %v835_v58, %v820_v57  ;;  %v932_v57 = vld [vmem:[#allocation3 + $0x10] sm:$0xff] }
 0x7f4   :  { %1388 = vtanh.f32 %v840_v59 }
 0x7f9   :  { %v837_v17 = vpop.f32.mrf.mxu2 }
 0x7fa   :  { %v1389_v63 = vpop.eup %1388  ;;  %v841_v18 = vadd.f32 %v837_v17, %v821_v62  ;;  %v933_v62 = vld [vmem:[#allocation3 + $0x18] sm:$0xff] }
 0x7fb   :  { %v844_v22 = vsel %vm72_vm2, %v1389_v63, %v816_v56  ;;  %v850_v23 = vsel %vm72_vm2, %v818_v55, %v1389_v63  ;;  %v930_v56 = vld [vmem:[#allocation3 + $0x60] sm:$0xff] }
 0x7fc   :  { %846 = vst.msk [vmem:[#allocation3 + $0x30] sm:$0xff] %vm200_vm1, %v844_v22  ;;  %1390 = vtanh.f32 %v841_v18  ;;  %v934_v58 = vsel %vm72_vm2, %v930_v56, %v932_v57 }
 0x7fd   :  { %852 = vst.msk [vmem:[#allocation3 + $0x40] sm:$0xff] %vm200_vm1, %v850_v23 }
 0x802   :  { %v1391_v0 = vpop.eup %1390 }
 0x803   :  { %v845_v1 = vsel %vm72_vm2, %v1391_v0, %v817_v61  ;;  %v851_v2 = vsel %vm72_vm2, %v819_v60, %v1391_v0  ;;  %v860_v3 = vpack.c.bf16 %v1391_v0, %v1389_v63  ;;  %v856_v5 = vld [vmem:[#allocation3 + $0x30] sm:$0xff]  ;;  %v931_v61 = vld [vmem:[#allocation3 + $0x68] sm:$0xff] }
 0x804   :  { %847 = vst.msk [vmem:[#allocation3 + $0x38] sm:$0xff] %vm200_vm1, %v845_v1  ;;  %v854_v4 = vld [vmem:[#allocation3 + $0x40] sm:$0xff]  ;;  %v935_v17 = vsel %vm72_vm2, %v931_v61, %v933_v62 }
 0x805   :  { %853 = vst.msk [vmem:[#allocation3 + $0x48] sm:$0xff] %vm200_vm1, %v851_v2  ;;  %1278 = vmatmul.msk.bf16.vlgmr.msrb.gmra.mxu1 %vm200_vm1, %v860_v3  ;;  %v858_v6 = vsel %vm72_vm2, %v854_v4, %v856_v5 }
 0x806   :  { %1332 = vmatpush.bf16.msrb.mxu1 %v1331_v26 }
 0x80a   :  { %1334 = vmatpush.bf16.msrb.mxu1 %v1330_v12 }
 0x80b   :  { %v857_v15 = vld [vmem:[#allocation3 + $0x38] sm:$0xff] }
 0x80c   :  { %v855_v14 = vld [vmem:[#allocation3 + $0x48] sm:$0xff] }
 0x80d   :  { %v859_v7 = vsel %vm72_vm2, %v855_v14, %v857_v15 }
 0x80e   :  { %1336 = vmatpush.bf16.msrb.mxu1 %v1329_v27 }
 0x812   :  { %1338 = vmatpush.bf16.msrb.mxu1 %v1328_v30 }
 0x882   :  { %v873_v10 = vpop.f32.mrf.mxu1 }
 0x883   :  { %v878_v13 = vadd.f32 %v873_v10, %v858_v6 }
 0x885   :  { %1392 = vtanh.f32 %v878_v13 }
 0x88a   :  { %v875_v16 = vpop.f32.mrf.mxu1 }
 0x88b   :  { %v1393_v8 = vpop.eup %1392  ;;  %v879_v9 = vadd.f32 %v875_v16, %v859_v7  ;;  %v968_v7 = vld [vmem:[#allocation3 + $0x70] sm:$0xff]  ;;  %v970_v16 = vld [vmem:[#allocation3] sm:$0xff] }
 0x88c   :  { %v882_v11 = vsel %vm72_vm2, %v1393_v8, %v854_v4  ;;  %v888_v19 = vsel %vm72_vm2, %v856_v5, %v1393_v8 }
 0x88d   :  { %884 = vst.msk [vmem:[#allocation3 + $0x40] sm:$0xff] %vm200_vm1, %v882_v11  ;;  %1394 = vtanh.f32 %v879_v9 }
 0x88e   :  { %890 = vst.msk [vmem:[#allocation3 + $0x30] sm:$0xff] %vm200_vm1, %v888_v19  ;;  %v969_v19 = vld [vmem:[#allocation3 + $0x78] sm:$0xff] }
 0x893   :  { %v1395_v20 = vpop.eup %1394 }
 0x894   :  { %v883_v21 = vsel %vm72_vm2, %v1395_v20, %v855_v14  ;;  %v889_v24 = vsel %vm72_vm2, %v857_v15, %v1395_v20  ;;  %v898_v25 = vpack.c.bf16 %v1395_v20, %v1393_v8  ;;  %v1014_v54 = vld [vmem:[#allocation3 + $0x40] sm:$0xff]  ;;  %v972_v8 = vsel %vm72_vm2, %v968_v7, %v970_v16  ;;  %v971_v20 = vld [vmem:[#allocation3 + $0x8] sm:$0xff] }
 0x895   :  { %885 = vst.msk [vmem:[#allocation3 + $0x48] sm:$0xff] %vm200_vm1, %v883_v21  ;;  %v1012_v51 = vld [vmem:[#allocation3 + $0x30] sm:$0xff]  ;;  %v973_v21 = vsel %vm72_vm2, %v969_v19, %v971_v20 }
 0x896   :  { %891 = vst.msk [vmem:[#allocation3 + $0x38] sm:$0xff] %vm200_vm1, %v889_v24  ;;  %1279 = vmatmul.msk.bf16.vlgmr.msrb.gmra.mxu2 %vm200_vm1, %v898_v25 }
 0x897   :  { %1333 = vmatpush.bf16.msrb.mxu2 %v1331_v26 }
 0x89b   :  { %1335 = vmatpush.bf16.msrb.mxu2 %v1330_v12 }
 0x89c   :  { %v1015_v53 = vld [vmem:[#allocation3 + $0x48] sm:$0xff] }
 0x89d   :  { %v1013_v50 = vld [vmem:[#allocation3 + $0x38] sm:$0xff]  ;;  %v1026_v55 = vpack.c.bf16 %v1015_v53, %v1014_v54 }
 0x89e   :  { %v1025_v52 = vpack.c.bf16 %v1013_v50, %v1012_v51 }
 0x89f   :  { %1337 = vmatpush.bf16.msrb.mxu2 %v1329_v27 }
 0x8a3   :  { %1339 = vmatpush.bf16.msrb.mxu2 %v1328_v30 }
 0x919   :  { %v911_v32 = vpop.f32.mrf.mxu2 }
 0x91a   :  { %v916_v33 = vadd.f32 %v911_v32, %v896_v31 }
 0x91c   :  { %1396 = vtanh.f32 %v916_v33 }
 0x921   :  { %v913_v37 = vpop.f32.mrf.mxu2 }
 0x922   :  { %v1397_v38 = vpop.eup %1396  ;;  %v917_v39 = vadd.f32 %v913_v37, %v897_v36 }
 0x923   :  { %v920_v40 = vsel %vm72_vm2, %v1397_v38, %v892_v28  ;;  %v926_v41 = vsel %vm72_vm2, %v894_v29, %v1397_v38 }
 0x924   :  { %922 = vst.msk [vmem:[#allocation3 + $0x50] sm:$0xff] %vm200_vm1, %v920_v40  ;;  %1398 = vtanh.f32 %v917_v39 }
 0x925   :  { %928 = vst.msk [vmem:[#allocation3 + $0x20] sm:$0xff] %vm200_vm1, %v926_v41 }
 0x92a   :  { %v1399_v42 = vpop.eup %1398 }
 0x92b   :  { %v921_v43 = vsel %vm72_vm2, %v1399_v42, %v893_v34  ;;  %v927_v44 = vsel %vm72_vm2, %v895_v35, %v1399_v42  ;;  %v936_v45 = vpack.c.bf16 %v1399_v42, %v1397_v38  ;;  %v1016_v6 = vld [vmem:[#allocation3 + $0x50] sm:$0xff] }
 0x92c   :  { %923 = vst.msk [vmem:[#allocation3 + $0x58] sm:$0xff] %vm200_vm1, %v921_v43  ;;  %v1010_v48 = vld [vmem:[#allocation3 + $0x20] sm:$0xff] }
 0x92d   :  { %929 = vst.msk [vmem:[#allocation3 + $0x28] sm:$0xff] %vm200_vm1, %v927_v44  ;;  %1280 = vmatmul.msk.bf16.vlgmr.msra.gmra.mxu1 %vm200_vm1, %v936_v45 }
 0x933   :  { %v1017_v5 = vld [vmem:[#allocation3 + $0x58] sm:$0xff] }
 0x934   :  { %v1011_v46 = vld [vmem:[#allocation3 + $0x28] sm:$0xff]  ;;  %v1027_v10 = vpack.c.bf16 %v1017_v5, %v1016_v6 }
 0x935   :  { %v1024_v49 = vpack.c.bf16 %v1011_v46, %v1010_v48 }
 0x93d   :  { %1300 = vmatmul.msk.bf16.vlgmr.msrb.gmra.mxu1 %vm200_vm1, %v1024_v49  ;;  %v1343_v49 = vld [vmem:[%s1952_s2 + $0x2] ss:$0 sm:$0xff] }
 0x94d   :  { %1301 = vmatmul.msk.bf16.gmra.mxu1 %vm200_vm1, %v1025_v52 }
 0x95d   :  { %1302 = vmatmul.msk.bf16.gmra.mxu1 %vm200_vm1, %v1026_v55 }
 0x9aa   :  { %v949_v59 = vpop.f32.mrf.mxu1 }
 0x9ab   :  { %v954_v60 = vadd.f32 %v949_v59, %v934_v58 }
 0x9ad   :  { %1400 = vtanh.f32 %v954_v60 }
 0x9b2   :  { %v951_v63 = vpop.f32.mrf.mxu1 }
 0x9b3   :  { %v1401_v18 = vpop.eup %1400  ;;  %v955_v22 = vadd.f32 %v951_v63, %v935_v17 }
 0x9b4   :  { %v958_v23 = vsel %vm72_vm2, %v1401_v18, %v930_v56  ;;  %v964_v0 = vsel %vm72_vm2, %v932_v57, %v1401_v18 }
 0x9b5   :  { %960 = vst.msk [vmem:[#allocation3 + $0x60] sm:$0xff] %vm200_vm1, %v958_v23  ;;  %1402 = vtanh.f32 %v955_v22 }
 0x9b6   :  { %966 = vst.msk [vmem:[#allocation3 + $0x10] sm:$0xff] %vm200_vm1, %v964_v0 }
 0x9ba   :  { %v1098_v47 = vpop.f32.mrf.mxu1 }
 0x9bb   :  { %v1403_v1 = vpop.eup %1402  ;;  %v1099_v53 = vadd.f32 %v1343_v49, %v1098_v47 }
 0x9bc   :  { %v959_v2 = vsel %vm72_vm2, %v1403_v1, %v931_v61  ;;  %v965_v3 = vsel %vm72_vm2, %v933_v62, %v1403_v1  ;;  %v974_v4 = vpack.c.bf16 %v1403_v1, %v1401_v18  ;;  %v1018_v14 = vld [vmem:[#allocation3 + $0x60] sm:$0xff] }
 0x9bd   :  { %961 = vst.msk [vmem:[#allocation3 + $0x68] sm:$0xff] %vm200_vm1, %v959_v2  ;;  %v1008_v38 = vld [vmem:[#allocation3 + $0x10] sm:$0xff]  ;;  %v1130_v57 = vsel %vm126_vm0, %v1099_v53, -inf }
 0x9be   :  { %967 = vst.msk [vmem:[#allocation3 + $0x18] sm:$0xff] %vm200_vm1, %v965_v3  ;;  %1281 = vmatmul.msk.bf16.vlgmr.msra.gmra.mxu2 %vm200_vm1, %v974_v4 }
 0x9c2   :  { %v1100_v41 = vpop.f32.mrf.mxu1 }
 0x9c3   :  { %v1101_v63 = vadd.f32 %v1343_v49, %v1100_v41 }
 0x9c4   :  { %v1019_v13 = vld [vmem:[#allocation3 + $0x68] sm:$0xff] }
 0x9c5   :  { %v1028_v15 = vpack.c.bf16 %v1019_v13, %v1018_v14  ;;  %v1009_v37 = vld [vmem:[#allocation3 + $0x18] sm:$0xff]  ;;  %v1145_v14 = vsel %vm126_vm0, %v1101_v63, -inf }
 0x9c6   :  { %v1023_v39 = vpack.c.bf16 %v1009_v37, %v1008_v38 }
 0x9ca   :  { %v1103_v43 = vpop.f32.mrf.mxu1 }
 0x9cb   :  { %v1104_v55 = vadd.f32 %v1343_v49, %v1103_v43 }
 0x9cd   :  { %v1132_v18 = vsel %vm126_vm0, %v1104_v55, -inf }
 0x9ce   :  { %1303 = vmatmul.msk.bf16.vlgmr.msrb.gmra.mxu2 %vm200_vm1, %v1027_v10 }
 0x9d2   :  { %v1105_v45 = vpop.f32.mrf.mxu1 }
 0x9d3   :  { %v1106_v10 = vadd.f32 %v1343_v49, %v1105_v45 }
 0x9da   :  { %v1108_v52 = vpop.f32.mrf.mxu1 }
 0x9db   :  { %v1109_v58 = vadd.f32 %v1343_v49, %v1108_v52 }
 0x9dd   :  { %v1134_v22 = vsel %vm126_vm0, %v1109_v58, -inf }
 0x9de   :  { %1304 = vmatmul.msk.bf16.gmra.mxu2 %vm200_vm1, %v1028_v15 }
 0x9e2   :  { %v1110_v2 = vpop.f32.mrf.mxu1 }
 0x9e3   :  { %v1111_v15 = vadd.f32 %v1343_v49, %v1110_v2 }
 0xa41   :  { %v987_v9 = vpop.f32.mrf.mxu2 }
 0xa42   :  { %v992_v11 = vadd.f32 %v987_v9, %v972_v8 }
 0xa44   :  { %1404 = vtanh.f32 %v992_v11 }
 0xa49   :  { %v989_v24 = vpop.f32.mrf.mxu2 }
 0xa4a   :  { %v1405_v25 = vpop.eup %1404  ;;  %v993_v26 = vadd.f32 %v989_v24, %v973_v21 }
 0xa4b   :  { %v996_v12 = vsel %vm72_vm2, %v1405_v25, %v968_v7  ;;  %v1002_v27 = vsel %vm72_vm2, %v970_v16, %v1405_v25  ;;  %v1147_v25 = vsel %vm126_vm0, %v1106_v10, -inf }
 0xa4c   :  { %998 = vst.msk [vmem:[#allocation3 + $0x70] sm:$0xff] %vm200_vm1, %v996_v12  ;;  %1406 = vtanh.f32 %v993_v26  ;;  %v1149_v12 = vsel %vm126_vm0, %v1111_v15, -inf }
 0xa4d   :  { %1004 = vst.msk [vmem:[#allocation3] sm:$0xff] %vm200_vm1, %v1002_v27 }
 0xa51   :  { %v1113_v40 = vpop.f32.mrf.mxu2 }
 0xa52   :  { %v1407_v28 = vpop.eup %1406  ;;  %v1114_v61 = vadd.f32 %v1343_v49, %v1113_v40 }
 0xa53   :  { %v997_v29 = vsel %vm72_vm2, %v1407_v28, %v969_v19  ;;  %v1003_v30 = vsel %vm72_vm2, %v971_v20, %v1407_v28  ;;  %v1020_v31 = vld [vmem:[#allocation3 + $0x70] sm:$0xff] }
 0xa54   :  { %999 = vst.msk [vmem:[#allocation3 + $0x78] sm:$0xff] %vm200_vm1, %v997_v29  ;;  %v1006_v33 = vld [vmem:[#allocation3] sm:$0xff]  ;;  %v1136_v5 = vsel %vm126_vm0, %v1114_v61, -inf }
 0xa55   :  { %1005 = vst.msk [vmem:[#allocation3 + $0x8] sm:$0xff] %vm200_vm1, %v1003_v30 }
 0xa59   :  { %v1115_v42 = vpop.f32.mrf.mxu2 }
 0xa5a   :  { %v1116_v21 = vadd.f32 %v1343_v49, %v1115_v42 }
 0xa5b   :  { %v1021_v32 = vld [vmem:[#allocation3 + $0x78] sm:$0xff] }
 0xa5c   :  { %v1007_v34 = vld [vmem:[#allocation3 + $0x8] sm:$0xff]  ;;  %v1029_v35 = vpack.c.bf16 %v1021_v32, %v1020_v31  ;;  %v1151_v32 = vsel %vm126_vm0, %v1116_v21, -inf }
 0xa5d   :  { %v1022_v36 = vpack.c.bf16 %v1007_v34, %v1006_v33 }
 0xa5e   :  { %1305 = vmatmul.msk.bf16.gmra.mxu2 %vm200_vm1, %v1029_v35 }
 0xa5f   :  { %1298 = vmatmul.msk.bf16.vlgmr.msrb.gmra.mxu0 %vm200_vm1, %v1022_v36 }
 0xa61   :  { %v1118_v44 = vpop.f32.mrf.mxu2 }
 0xa62   :  { %v1119_v23 = vadd.f32 %v1343_v49, %v1118_v44 }
 0xa64   :  { %v1138_v7 = vsel %vm126_vm0, %v1119_v23, -inf }
 0xa69   :  { %v1120_v48 = vpop.f32.mrf.mxu2 }
 0xa6a   :  { %v1121_v27 = vadd.f32 %v1343_v49, %v1120_v48 }
 0xa6c   :  { %v1153_v34 = vsel %vm126_vm0, %v1121_v27, -inf }
 0xa6f   :  { %1299 = vmatmul.msk.bf16.gmra.mxu0 %vm200_vm1, %v1023_v39 }
 0xadc   :  { %v1088_v46 = vpop.f32.mrf.mxu0 }
 0xadd   :  { %v1089_v51 = vadd.f32 %v1343_v49, %v1088_v46 }
 0xadf   :  { %v1128_v54 = vsel %vm126_vm0, %v1089_v51, -inf }
 0xae0   :  { %v1131_v59 = vmax.f32 %v1128_v54, %v1130_v57 }
 0xae1   :  { %v1123_v56 = vpop.f32.mrf.mxu2 }
 0xae2   :  { %v1124_v0 = vadd.f32 %v1343_v49, %v1123_v56  ;;  %v1135_v3 = vmax.f32 %v1131_v59, %v1134_v22 }
 0xae4   :  { %v1090_v50 = vpop.f32.mrf.mxu0  ;;  %v1140_v16 = vsel %vm126_vm0, %v1124_v0, -inf  ;;  %v1139_v8 = vmax.f32 %v1135_v3, %v1138_v7 }
 0xae5   :  { %v1091_v62 = vadd.f32 %v1343_v49, %v1090_v50 }
 0xae7   :  { %v1143_v6 = vsel %vm126_vm0, %v1091_v62, -inf }
 0xae8   :  { %v1146_v9 = vmax.f32 %v1143_v6, %v1145_v14 }
 0xae9   :  { %v1125_v11 = vpop.f32.mrf.mxu2 }
 0xaea   :  { %v1126_v28 = vadd.f32 %v1343_v49, %v1125_v11  ;;  %v1150_v30 = vmax.f32 %v1146_v9, %v1149_v12 }
 0xaec   :  { %v1093_v60 = vpop.f32.mrf.mxu0  ;;  %v1155_v35 = vsel %vm126_vm0, %v1126_v28, -inf  ;;  %v1154_v36 = vmax.f32 %v1150_v30, %v1153_v34 }
 0xaed   :  { %v1094_v17 = vadd.f32 %v1343_v49, %v1093_v60 }
 0xaef   :  { %v1129_v1 = vsel %vm126_vm0, %v1094_v17, -inf }
 0xaf0   :  { %v1133_v4 = vmax.f32 %v1129_v1, %v1132_v18 }
 0xaf2   :  { %v1137_v13 = vmax.f32 %v1133_v4, %v1136_v5 }
 0xaf4   :  { %v1141_v19 = vmax.f32 %v1137_v13, %v1140_v16  ;;  %v1095_v20 = vpop.f32.mrf.mxu0 }
 0xaf5   :  { %v1096_v24 = vadd.f32 %v1343_v49, %v1095_v20 }
 0xaf6   :  { %v1142_v26 = vmax.f32 %v1139_v8, %v1141_v19 }
 0xaf7   :  { %v1144_v29 = vsel %vm126_vm0, %v1096_v24, -inf }
 0xaf8   :  { %1158 = vst.msk [vmem:[%s1954_s3] sm:$0xff] %vm126_vm0, %v1142_v26  ;;  %v1148_v31 = vmax.f32 %v1144_v29, %v1147_v25 }
 0xafa   :  { %v1152_v33 = vmax.f32 %v1148_v31, %v1151_v32 }
 0xafc   :  { %v1156_v37 = vmax.f32 %v1152_v33, %v1155_v35 }
 0xafe   :  { %v1157_v38 = vmax.f32 %v1154_v36, %v1156_v37 }
 0xb00   :  { %1159 = vst.msk [vmem:[%s1954_s3 + $0x8] sm:$0xff] %vm126_vm0, %v1157_v38 }

</bundles_post_ra>
